<compile_context>
chip_gen: v7x
topology: tpu7x:2x2x1
jax: 0.10.0
libtpu: 0.0.40
codegen_flags: <defaults>
</compile_context>

<pallas_src>
import functools

import jax
import jax.numpy as jnp
import numpy as np
from jax.experimental import pallas as pl
from jax.experimental.pallas import tpu as pltpu


def _layernorm_kernel(x_ref, g_ref, b_ref, o_ref, *, eps):
    # x_ref: (tn, D) row tile; g_ref / b_ref: (1, D) resident affine params.
    x = x_ref[...].astype(jnp.float32)                         # (tn, D)
    d = x.shape[-1]
    inv_d = 1.0 / d
    s1 = jnp.sum(x, axis=-1, keepdims=True)                    # XLU reduce
    s2 = jnp.sum(x * x, axis=-1, keepdims=True)                # VPU mul -> XLU reduce
    mean = s1 * inv_d
    var = jnp.maximum(s2 * inv_d - mean * mean, 0.0)           # one-pass variance
    inv = jax.lax.rsqrt(var + eps)                             # EUP
    o_ref[...] = ((x - mean) * inv * g_ref[...] + b_ref[...]).astype(o_ref.dtype)


def _choose_row_tile(n_rows, dim, itemsize, *, target_bytes=6 << 20):
    """Rows per tile so one (tn, dim) input buffer is ~target_bytes (~6 MiB).
    Double-buffered in+out working set ~4*tile (~24 MiB) stays under the 48 MiB
    scoped-VMEM limit even on v7x (64 MiB physical), while per-grid-step
    overhead (~0.35 us) drops to a few percent of the DMA time per step."""
    bytes_per_row = max(1, int(dim) * int(itemsize))
    tn = max(8, target_bytes // bytes_per_row)
    tn -= tn % 8                                   # sublane multiple of 8
    n_up = pl.cdiv(n_rows, 8) * 8                  # don't exceed (rounded-up) row count
    return int(max(8, min(tn, n_up)))


def _layernorm_call(x, g2d, b2d, *, tn, eps, dim_semantics, vmem_limit_bytes):
    N, D = x.shape
    grid = (pl.cdiv(N, tn),)                       # ragged tail masked by Pallas
    return pl.pallas_call(
        functools.partial(_layernorm_kernel, eps=eps),
        out_shape=jax.ShapeDtypeStruct((N, D), x.dtype),
        grid_spec=pltpu.PrefetchScalarGridSpec(
            num_scalar_prefetch=0,
            grid=grid,
            in_specs=[
                pl.BlockSpec((tn, D), lambda i: (i, 0)),   # row tile of features
                pl.BlockSpec((1, D), lambda i: (0, 0)),    # gamma (resident)
                pl.BlockSpec((1, D), lambda i: (0, 0)),    # beta  (resident)
            ],
            out_specs=pl.BlockSpec((tn, D), lambda i: (i, 0)),
        ),
        compiler_params=pltpu.CompilerParams(
            dimension_semantics=dim_semantics,
            vmem_limit_bytes=vmem_limit_bytes,
        ),
    )(x, g2d, b2d)


def identity_norm(h, gamma, beta, *, eps=1e-5, block_rows=None):
    """LayerNorm over the last axis of h.  h: (..., D); gamma, beta: (D,)."""
    orig_shape = h.shape
    D = orig_shape[-1]
    x = h.reshape(-1, D)
    N = x.shape[0]

    itemsize = jnp.dtype(h.dtype).itemsize
    tn = block_rows if block_rows is not None else _choose_row_tile(N, D, itemsize)

    g2d = gamma.reshape(1, D).astype(jnp.float32)
    b2d = beta.reshape(1, D).astype(jnp.float32)

    # v7x only reaches its ~3.2 TB/s HBM roofline if both TensorCores pull rows;
    # CORE_PARALLEL actually shards the grid axis across TCs.  Fall back to
    # "parallel" where core_parallel is unavailable or rejected (v5e/v6e single-TC
    # chips lose nothing from the fallback).
    semantics_choices = []
    core_parallel = getattr(pltpu, "CORE_PARALLEL", None)
    if core_parallel is not None:
        semantics_choices.append((core_parallel,))
    semantics_choices.append(("parallel",))

    out = None
    last_err = None
    for sem in semantics_choices:
        try:
            out = _layernorm_call(
                x, g2d, b2d,
                tn=tn, eps=eps,
                dim_semantics=sem,
                vmem_limit_bytes=48 * 1024 * 1024,
            )
            break
        except Exception as e:   # pragma: no cover - chip-specific lowering fallback
            last_err = e
            out = None
    if out is None:
        raise last_err

    return out.reshape(orig_shape)


if __name__ == "__main__":
    # Node features h: (num_nodes, dim_out). dim_out=128 keeps the output lane-dense.
    num_nodes, dim_out = 200, 128
    key = jax.random.PRNGKey(0)
    kh, kg, kb = jax.random.split(key, 3)
    h = jax.random.normal(kh, (num_nodes, dim_out), dtype=jnp.float32)
    # torch.nn.LayerNorm init is weight=1, bias=0; perturb so the affine path is exercised.
    gamma = 1.0 + 0.1 * jax.random.normal(kg, (dim_out,), dtype=jnp.float32)
    beta = 0.1 * jax.random.normal(kb, (dim_out,), dtype=jnp.float32)

    out = jax.block_until_ready(identity_norm(h, gamma, beta))

    # Pure-JAX reference == torch.nn.LayerNorm(dim_out) semantics (eps=1e-5).
    mean = jnp.mean(h, axis=-1, keepdims=True)
    var = jnp.mean((h - mean) ** 2, axis=-1, keepdims=True)
    ref = (h - mean) * jax.lax.rsqrt(var + 1e-5) * gamma + beta

    assert out.shape == (num_nodes, dim_out)
    np.testing.assert_allclose(np.asarray(out), np.asarray(ref), rtol=1e-4, atol=1e-4)
    print("KERNEL_OK")
</pallas_src>

<mosaic_0001>
module attributes {stable_mosaic.version = 11 : i64} {
  func.func @_layernorm_kernel(%arg0: i32, %arg1: memref<200x128xf32, #tpu.memory_space<vmem>>, %arg2: memref<1x128xf32, #tpu.memory_space<vmem>>, %arg3: memref<1x128xf32, #tpu.memory_space<vmem>>, %arg4: memref<200x128xf32, #tpu.memory_space<vmem>>) attributes {dimension_semantics = [#tpu.dimension_semantics<core_parallel>], iteration_bounds = array<i64: 1>, scalar_prefetch = 0 : i64, scratch_operands = 0 : i64, tpu.core_type = #tpu.core_type<tc>, window_params = [{transform_indices = @transform_0, window_bounds = array<i64: 200, 128>}, {pipeline_mode = #tpu.pipeline_mode<synchronous>, transform_indices = @transform_1, window_bounds = array<i64: 1, 128>}, {pipeline_mode = #tpu.pipeline_mode<synchronous>, transform_indices = @transform_2, window_bounds = array<i64: 1, 128>}, {transform_indices = @transform_3, window_bounds = array<i64: 200, 128>}]} {
    %c0 = arith.constant 0 : index
    %c0_0 = arith.constant 0 : index
    %0 = vector.load %arg1[%c0, %c0_0] : memref<200x128xf32, #tpu.memory_space<vmem>>, vector<200x128xf32>
    %cst = arith.constant dense<0.000000e+00> : vector<200xf32>
    %1 = vector.multi_reduction <add>, %0, %cst [1] : vector<200x128xf32> to vector<200xf32>
    %2 = vector.shape_cast %1 : vector<200xf32> to vector<200x1xf32>
    %3 = arith.mulf %0, %0 : vector<200x128xf32>
    %cst_1 = arith.constant dense<0.000000e+00> : vector<200xf32>
    %4 = vector.multi_reduction <add>, %3, %cst_1 [1] : vector<200x128xf32> to vector<200xf32>
    %5 = vector.shape_cast %4 : vector<200xf32> to vector<200x1xf32>
    %cst_2 = arith.constant 7.812500e-03 : f32
    %6 = vector.broadcast %cst_2 : f32 to vector<200x1xf32>
    %7 = arith.mulf %2, %6 : vector<200x1xf32>
    %cst_3 = arith.constant 7.812500e-03 : f32
    %8 = vector.broadcast %cst_3 : f32 to vector<200x1xf32>
    %9 = arith.mulf %5, %8 : vector<200x1xf32>
    %10 = arith.mulf %7, %7 : vector<200x1xf32>
    %11 = arith.subf %9, %10 : vector<200x1xf32>
    %cst_4 = arith.constant 0.000000e+00 : f32
    %12 = vector.broadcast %cst_4 : f32 to vector<200x1xf32>
    %13 = arith.maximumf %11, %12 : vector<200x1xf32>
    %cst_5 = arith.constant 9.99999974E-6 : f32
    %14 = vector.broadcast %cst_5 : f32 to vector<200x1xf32>
    %15 = arith.addf %13, %14 : vector<200x1xf32>
    %16 = math.rsqrt %15 : vector<200x1xf32>
    %17 = vector.broadcast %7 : vector<200x1xf32> to vector<200x128xf32>
    %18 = arith.subf %0, %17 : vector<200x128xf32>
    %19 = vector.broadcast %16 : vector<200x1xf32> to vector<200x128xf32>
    %20 = arith.mulf %18, %19 : vector<200x128xf32>
    %c0_6 = arith.constant 0 : index
    %c0_7 = arith.constant 0 : index
    %21 = vector.load %arg2[%c0_6, %c0_7] : memref<1x128xf32, #tpu.memory_space<vmem>>, vector<1x128xf32>
    %22 = vector.broadcast %21 : vector<1x128xf32> to vector<200x128xf32>
    %23 = arith.mulf %20, %22 : vector<200x128xf32>
    %c0_8 = arith.constant 0 : index
    %c0_9 = arith.constant 0 : index
    %24 = vector.load %arg3[%c0_8, %c0_9] : memref<1x128xf32, #tpu.memory_space<vmem>>, vector<1x128xf32>
    %25 = vector.broadcast %24 : vector<1x128xf32> to vector<200x128xf32>
    %26 = arith.addf %23, %25 : vector<200x128xf32>
    %c0_10 = arith.constant 0 : index
    %c0_11 = arith.constant 0 : index
    %27 = vector.load %arg4[%c0_10, %c0_11] : memref<200x128xf32, #tpu.memory_space<vmem>>, vector<200x128xf32>
    tpu.vector_store %arg4[%c0_10, %c0_11], %26 {strides = array<i32>} : memref<200x128xf32, #tpu.memory_space<vmem>>, vector<200x128xf32>,
    return
  }
  func.func @transform_0(%arg0: i32) -> (i32, i32) {
    %c0_i32 = arith.constant 0 : i32
    %c0_i32_0 = arith.constant 0 : i32
    return %arg0, %c0_i32 : i32, i32
  }
  func.func @transform_1(%arg0: i32) -> (i32, i32) {
    %c0_i32 = arith.constant 0 : i32
    %c0_i32_0 = arith.constant 0 : i32
    %c0_i32_1 = arith.constant 0 : i32
    return %c0_i32, %c0_i32_0 : i32, i32
  }
  func.func @transform_2(%arg0: i32) -> (i32, i32) {
    %c0_i32 = arith.constant 0 : i32
    %c0_i32_0 = arith.constant 0 : i32
    %c0_i32_1 = arith.constant 0 : i32
    return %c0_i32, %c0_i32_0 : i32, i32
  }
  func.func @transform_3(%arg0: i32) -> (i32, i32) {
    %c0_i32 = arith.constant 0 : i32
    %c0_i32_0 = arith.constant 0 : i32
    return %arg0, %c0_i32 : i32, i32
  }
}

module attributes {stable_mosaic.version = 11 : i64} {
  func.func @_layernorm_kernel(%arg0: i32, %arg1: memref<200x128xf32, #tpu.memory_space<vmem>>, %arg2: memref<1x128xf32, #tpu.memory_space<vmem>>, %arg3: memref<1x128xf32, #tpu.memory_space<vmem>>, %arg4: memref<200x128xf32, #tpu.memory_space<vmem>>) attributes {dimension_semantics = [#tpu.dimension_semantics<parallel>], iteration_bounds = array<i64: 1>, scalar_prefetch = 0 : i64, scratch_operands = 0 : i64, tpu.core_type = #tpu.core_type<tc>, window_params = [{transform_indices = @transform_0, window_bounds = array<i64: 200, 128>}, {pipeline_mode = #tpu.pipeline_mode<synchronous>, transform_indices = @transform_1, window_bounds = array<i64: 1, 128>}, {pipeline_mode = #tpu.pipeline_mode<synchronous>, transform_indices = @transform_2, window_bounds = array<i64: 1, 128>}, {transform_indices = @transform_3, window_bounds = array<i64: 200, 128>}]} {
    %c0 = arith.constant 0 : index
    %c0_0 = arith.constant 0 : index
    %0 = vector.load %arg1[%c0, %c0_0] : memref<200x128xf32, #tpu.memory_space<vmem>>, vector<200x128xf32>
    %cst = arith.constant dense<0.000000e+00> : vector<200xf32>
    %1 = vector.multi_reduction <add>, %0, %cst [1] : vector<200x128xf32> to vector<200xf32>
    %2 = vector.shape_cast %1 : vector<200xf32> to vector<200x1xf32>
    %3 = arith.mulf %0, %0 : vector<200x128xf32>
    %cst_1 = arith.constant dense<0.000000e+00> : vector<200xf32>
    %4 = vector.multi_reduction <add>, %3, %cst_1 [1] : vector<200x128xf32> to vector<200xf32>
    %5 = vector.shape_cast %4 : vector<200xf32> to vector<200x1xf32>
    %cst_2 = arith.constant 7.812500e-03 : f32
    %6 = vector.broadcast %cst_2 : f32 to vector<200x1xf32>
    %7 = arith.mulf %2, %6 : vector<200x1xf32>
    %cst_3 = arith.constant 7.812500e-03 : f32
    %8 = vector.broadcast %cst_3 : f32 to vector<200x1xf32>
    %9 = arith.mulf %5, %8 : vector<200x1xf32>
    %10 = arith.mulf %7, %7 : vector<200x1xf32>
    %11 = arith.subf %9, %10 : vector<200x1xf32>
    %cst_4 = arith.constant 0.000000e+00 : f32
    %12 = vector.broadcast %cst_4 : f32 to vector<200x1xf32>
    %13 = arith.maximumf %11, %12 : vector<200x1xf32>
    %cst_5 = arith.constant 9.99999974E-6 : f32
    %14 = vector.broadcast %cst_5 : f32 to vector<200x1xf32>
    %15 = arith.addf %13, %14 : vector<200x1xf32>
    %16 = math.rsqrt %15 : vector<200x1xf32>
    %17 = vector.broadcast %7 : vector<200x1xf32> to vector<200x128xf32>
    %18 = arith.subf %0, %17 : vector<200x128xf32>
    %19 = vector.broadcast %16 : vector<200x1xf32> to vector<200x128xf32>
    %20 = arith.mulf %18, %19 : vector<200x128xf32>
    %c0_6 = arith.constant 0 : index
    %c0_7 = arith.constant 0 : index
    %21 = vector.load %arg2[%c0_6, %c0_7] : memref<1x128xf32, #tpu.memory_space<vmem>>, vector<1x128xf32>
    %22 = vector.broadcast %21 : vector<1x128xf32> to vector<200x128xf32>
    %23 = arith.mulf %20, %22 : vector<200x128xf32>
    %c0_8 = arith.constant 0 : index
    %c0_9 = arith.constant 0 : index
    %24 = vector.load %arg3[%c0_8, %c0_9] : memref<1x128xf32, #tpu.memory_space<vmem>>, vector<1x128xf32>
    %25 = vector.broadcast %24 : vector<1x128xf32> to vector<200x128xf32>
    %26 = arith.addf %23, %25 : vector<200x128xf32>
    %c0_10 = arith.constant 0 : index
    %c0_11 = arith.constant 0 : index
    %27 = vector.load %arg4[%c0_10, %c0_11] : memref<200x128xf32, #tpu.memory_space<vmem>>, vector<200x128xf32>
    tpu.vector_store %arg4[%c0_10, %c0_11], %26 {strides = array<i32>} : memref<200x128xf32, #tpu.memory_space<vmem>>, vector<200x128xf32>,
    return
  }
  func.func @transform_0(%arg0: i32) -> (i32, i32) {
    %c0_i32 = arith.constant 0 : i32
    %c0_i32_0 = arith.constant 0 : i32
    return %arg0, %c0_i32 : i32, i32
  }
  func.func @transform_1(%arg0: i32) -> (i32, i32) {
    %c0_i32 = arith.constant 0 : i32
    %c0_i32_0 = arith.constant 0 : i32
    %c0_i32_1 = arith.constant 0 : i32
    return %c0_i32, %c0_i32_0 : i32, i32
  }
  func.func @transform_2(%arg0: i32) -> (i32, i32) {
    %c0_i32 = arith.constant 0 : i32
    %c0_i32_0 = arith.constant 0 : i32
    %c0_i32_1 = arith.constant 0 : i32
    return %c0_i32, %c0_i32_0 : i32, i32
  }
  func.func @transform_3(%arg0: i32) -> (i32, i32) {
    %c0_i32 = arith.constant 0 : i32
    %c0_i32_0 = arith.constant 0 : i32
    return %arg0, %c0_i32 : i32, i32
  }
}

</mosaic_0001>

<bundles_post_ra>
// kernel: tpu_custom_call.1
= control target key start
LH: loop header
LB: loop body
LE: loop exit
PB: predicated region body
PF: predicated region fallthrough
CT: control target
= control target key end

     0   :  { %s658_s12 = sld [smem:[#allocation0]]   ;;  %s1159_s0 = inlined_call_operand.hbm [shape: f32[200,128], index: 0, kind: input, shape index: {}]   ;;  %s1160_s1 = inlined_call_operand.vmem [shape: f32[1,128], index: 1, kind: input, shape index: {}]   ;;  %s1161_s2 = inlined_call_operand.vmem [shape: f32[1,128], index: 2, kind: input, shape index: {}]   ;;  %s1162_s3 = inlined_call_operand.hbm [shape: f32[200,128], index: 3, kind: output, shape index: {}]  }
   0x1   :  { %8 = vsyncpa [#allocation3], 0 }
   0x2   :  { %9 = vsyncpa [#allocation4], 0  ;;  %s634_s14 = smov [#allocation2]   ;;  %s584_s22 = scalar_lea.hbm %s1159_s0, 3200 }
   0x3   :  { %s18_s15 = sshll.u32 %s634_s14, 4  ;;  %s19_s15 = int_to_ptr.vmem [resolvable:$true] %s18_s15 }
   0x6   :  { %s526_s13 = smul.u32 3200, %s658_s12 }
   0x8   :  { %s17_s18 = scalar_lea.hbm %s1159_s0, %s526_s13 }
   0x9   :  { %s582_s19 = scalar_lea.hbm %s17_s18, 3200  ;;  %p585_p1 = scmp.lt.u32.totalorder %s17_s18, %s1159_s0 }
   0xa   :  { %p583_p0 = scmp.ne.s32.totalorder %s17_s18, %s582_s19  ;;  %p586_p2 = scmp.lt.u32.totalorder %s584_s22, %s582_s19 }
   0xb   :  { %p588_p4 = scmp.lt.u32.totalorder %s582_s19, %s17_s18 }
   0xc   :  { %p587_p3 = por %p586_p2, %p585_p1 }
   0xe   :  { %p589_p5 = por %p588_p4, %p587_p3 }
  0x10   :  { %p590_p6 = pnand %p589_p5, %p583_p0 }
  0x12   :  { %593 = shalt.err (!%p590_p6)
}
  0x13   :  { %s594_s25 = scalar_lea.vmem %s19_s15, 3200  ;;  %p599_p8 = scmp.lt.s32.totalorder %s19_s15, %s19_s15 }
  0x14   :  { %p595_p7 = scmp.ne.s32.totalorder %s19_s15, %s594_s25  ;;  %p600_p9 = scmp.lt.s32.totalorder %s594_s25, %s594_s25 }
  0x16   :  { %p601_p10 = por %p600_p9, %p599_p8 }
  0x18   :  { %p602_p11 = pnand %p601_p10, %p595_p7 }
  0x1a   :  { %605 = shalt.err (!%p602_p11)
}
  0x1b   :  { %s635_s26 = smov 128   ;;  %s636_s27 = smov 8  }
  0x1c   :  { %24 = dma.hbm_to_vmem [thread:$0]  %s17_s18, 3200, %s19_s15, [#allocation3], %s635_s26, %s635_s26, %s636_s27  }
  0x1d   :  { %630 = dma.done.wait [#allocation3], 3200  }
  0x1e   :  { %631 = vsyncadd [#allocation3], 4294964096  ;;  %v675_v0 = vld [vmem:[#allocation2 + $0x10] sm:$0xff]  ;;  %v677_v1 = vld [vmem:[#allocation2] sm:$0xff]  ;;  %s505_s6 = scalar_lea.hbm %s1162_s3, %s526_s13 }
  0x1f   :  { %63 = vadd.xlane.f32.xlu1 %v675_v0  ;;  %59 = vadd.xlane.f32.xlu0 %v677_v1  ;;  %v681_v2 = vld [vmem:[#allocation2 + $0x18] sm:$0xff]  ;;  %v683_v3 = vld [vmem:[#allocation2 + $0x8] sm:$0xff]  ;;  %v689_v5 = vld [vmem:[#allocation2 + $0x20] sm:$0xff]  ;;  %v109_v24 = vmul.f32 %v677_v1, %v677_v1  ;;  %v111_v27 = vmul.f32 %v675_v0, %v675_v0 }
  0x20   :  { %v687_v4 = vld [vmem:[#allocation2 + $0x28] sm:$0xff]  ;;  %v693_v6 = vld [vmem:[#allocation2 + $0x38] sm:$0xff]  ;;  %v695_v7 = vld [vmem:[#allocation2 + $0x30] sm:$0xff]  ;;  %v110_v26 = vmul.f32 %v683_v3, %v683_v3  ;;  %v112_v28 = vmul.f32 %v681_v2, %v681_v2  ;;  %v113_v29 = vmul.f32 %v689_v5, %v689_v5 }
  0x21   :  { %v699_v8 = vld [vmem:[#allocation2 + $0x48] sm:$0xff]  ;;  %v701_v9 = vld [vmem:[#allocation2 + $0x40] sm:$0xff]  ;;  %v705_v10 = vld [vmem:[#allocation2 + $0x58] sm:$0xff]  ;;  %v114_v30 = vmul.f32 %v687_v4, %v687_v4  ;;  %v115_v31 = vmul.f32 %v695_v7, %v695_v7  ;;  %v116_v32 = vmul.f32 %v693_v6, %v693_v6 }
  0x22   :  { %1179 = vst [vmem:[#allocation8_spill] sm:$0xff] %v705_v10  ;;  %v707_v11 = vld [vmem:[#allocation2 + $0x50] sm:$0xff]  ;;  %v711_v12 = vld [vmem:[#allocation2 + $0x68] sm:$0xff]  ;;  %v713_v13 = vld [vmem:[#allocation2 + $0x60] sm:$0xff]  ;;  %v117_v33 = vmul.f32 %v701_v9, %v701_v9  ;;  %v118_v34 = vmul.f32 %v699_v8, %v699_v8  ;;  %v120_v36 = vmul.f32 %v705_v10, %v705_v10 }
  0x23   :  { %65 = vadd.xlane.f32.xlu1 %v681_v2  ;;  %61 = vadd.xlane.f32.xlu0 %v683_v3  ;;  %1180 = vst [vmem:[#allocation9_spill] sm:$0xff] %v711_v12  ;;  %v717_v14 = vld [vmem:[#allocation2 + $0x78] sm:$0xff]  ;;  %v719_v15 = vld [vmem:[#allocation2 + $0x70] sm:$0xff]  ;;  %v723_v16 = vld [vmem:[#allocation2 + $0x88] sm:$0xff]  ;;  %v119_v35 = vmul.f32 %v707_v11, %v707_v11  ;;  %v121_v37 = vmul.f32 %v713_v13, %v713_v13 }
  0x24   :  { %1181 = vst [vmem:[#allocation10_spill] sm:$0xff] %v723_v16  ;;  %v725_v17 = vld [vmem:[#allocation2 + $0x80] sm:$0xff]  ;;  %v729_v18 = vld [vmem:[#allocation2 + $0x98] sm:$0xff]  ;;  %v731_v19 = vld [vmem:[#allocation2 + $0x90] sm:$0xff]  ;;  %v122_v38 = vmul.f32 %v711_v12, %v711_v12  ;;  %v123_v39 = vmul.f32 %v719_v15, %v719_v15  ;;  %v124_v40 = vmul.f32 %v717_v14, %v717_v14  ;;  %v126_v42 = vmul.f32 %v723_v16, %v723_v16 }
  0x25   :  { %1182 = vst [vmem:[#allocation11_spill] sm:$0xff] %v729_v18  ;;  %1183 = vst [vmem:[#allocation12_spill] sm:$0xff] %v731_v19  ;;  %v735_v20 = vld [vmem:[#allocation2 + $0xa8] sm:$0xff]  ;;  %v737_v21 = vld [vmem:[#allocation2 + $0xa0] sm:$0xff]  ;;  %v125_v41 = vmul.f32 %v725_v17, %v725_v17  ;;  %v127_v43 = vmul.f32 %v731_v19, %v731_v19  ;;  %v128_v44 = vmul.f32 %v729_v18, %v729_v18 }
  0x26   :  { %1184 = vst [vmem:[#allocation13_spill] sm:$0xff] %v735_v20  ;;  %1185 = vst [vmem:[#allocation14_spill] sm:$0xff] %v737_v21  ;;  %v741_v22 = vld [vmem:[#allocation2 + $0xb8] sm:$0xff]  ;;  %v743_v23 = vld [vmem:[#allocation2 + $0xb0] sm:$0xff]  ;;  %v129_v45 = vmul.f32 %v737_v21, %v737_v21  ;;  %v130_v46 = vmul.f32 %v735_v20, %v735_v20 }
  0x27   :  { %69 = vadd.xlane.f32.xlu1 %v687_v4  ;;  %67 = vadd.xlane.f32.xlu0 %v689_v5  ;;  %1186 = vst [vmem:[#allocation15_spill] sm:$0xff] %v741_v22  ;;  %1187 = vst [vmem:[#allocation16_spill] sm:$0xff] %v743_v23  ;;  %v749_v25 = vld [vmem:[#allocation2 + $0xc0] sm:$0xff]  ;;  %v131_v47 = vmul.f32 %v743_v23, %v743_v23  ;;  %v132_v48 = vmul.f32 %v741_v22, %v741_v22 }
  0x28   :  { %1188 = vst [vmem:[#allocation17_spill] sm:$0xff] %v749_v25  ;;  %v133_v49 = vmul.f32 %v749_v25, %v749_v25 }
  0x2b   :  { %73 = vadd.xlane.f32.xlu1 %v693_v6  ;;  %71 = vadd.xlane.f32.xlu0 %v695_v7 }
  0x2f   :  { %77 = vadd.xlane.f32.xlu1 %v699_v8  ;;  %75 = vadd.xlane.f32.xlu0 %v701_v9 }
  0x33   :  { %81 = vadd.xlane.f32.xlu1 %v705_v10  ;;  %79 = vadd.xlane.f32.xlu0 %v707_v11 }
  0x37   :  { %85 = vadd.xlane.f32.xlu1 %v711_v12  ;;  %83 = vadd.xlane.f32.xlu0 %v713_v13 }
  0x3b   :  { %89 = vadd.xlane.f32.xlu1 %v717_v14  ;;  %87 = vadd.xlane.f32.xlu0 %v719_v15 }
  0x3f   :  { %93 = vadd.xlane.f32.xlu1 %v723_v16  ;;  %91 = vadd.xlane.f32.xlu0 %v725_v17 }
  0x43   :  { %97 = vadd.xlane.f32.xlu1 %v729_v18  ;;  %95 = vadd.xlane.f32.xlu0 %v731_v19 }
  0x47   :  { %101 = vadd.xlane.f32.xlu1 %v735_v20  ;;  %99 = vadd.xlane.f32.xlu0 %v737_v21 }
  0x4b   :  { %105 = vadd.xlane.f32.xlu1 %v741_v22  ;;  %103 = vadd.xlane.f32.xlu0 %v743_v23 }
  0x4f   :  { %107 = vadd.xlane.f32.xlu0 %v749_v25  ;;  %134 = vadd.xlane.f32.xlu1 %v109_v24 }
  0x53   :  { %136 = vadd.xlane.f32.xlu0 %v110_v26  ;;  %138 = vadd.xlane.f32.xlu1 %v111_v27 }
  0x57   :  { %140 = vadd.xlane.f32.xlu0 %v112_v28  ;;  %142 = vadd.xlane.f32.xlu1 %v113_v29 }
  0x5b   :  { %144 = vadd.xlane.f32.xlu0 %v114_v30  ;;  %146 = vadd.xlane.f32.xlu1 %v115_v31 }
  0x5f   :  { %148 = vadd.xlane.f32.xlu0 %v116_v32  ;;  %150 = vadd.xlane.f32.xlu1 %v117_v33 }
  0x63   :  { %152 = vadd.xlane.f32.xlu0 %v118_v34  ;;  %154 = vadd.xlane.f32.xlu1 %v119_v35 }
  0x67   :  { %156 = vadd.xlane.f32.xlu0 %v120_v36  ;;  %158 = vadd.xlane.f32.xlu1 %v121_v37 }
  0x6b   :  { %160 = vadd.xlane.f32.xlu0 %v122_v38  ;;  %162 = vadd.xlane.f32.xlu1 %v123_v39 }
  0x6f   :  { %164 = vadd.xlane.f32.xlu0 %v124_v40  ;;  %166 = vadd.xlane.f32.xlu1 %v125_v41 }
  0x73   :  { %168 = vadd.xlane.f32.xlu0 %v126_v42  ;;  %170 = vadd.xlane.f32.xlu1 %v127_v43 }
  0x77   :  { %172 = vadd.xlane.f32.xlu0 %v128_v44  ;;  %174 = vadd.xlane.f32.xlu1 %v129_v45 }
  0x7b   :  { %176 = vadd.xlane.f32.xlu0 %v130_v46  ;;  %178 = vadd.xlane.f32.xlu1 %v131_v47 }
  0x7f   :  { %180 = vadd.xlane.f32.xlu0 %v132_v48  ;;  %182 = vadd.xlane.f32.xlu1 %v133_v49 }
  0xac   :  { %v64_v50 = vpop.xlane.xlu1 %63  ;;  %v60_v51 = vpop.xlane.xlu0 %59 }
  0xad   :  { %v814_v33 = vmul.f32 0.0078125, %v64_v50  ;;  %v816_v34 = vmul.f32 0.0078125, %v60_v51 }
  0xaf   :  { %v236_v40 = vmul.f32 %v814_v33, %v814_v33  ;;  %v234_v43 = vmul.f32 %v816_v34, %v816_v34 }
  0xb0   :  { %v66_v52 = vpop.xlane.xlu1 %65  ;;  %v62_v53 = vpop.xlane.xlu0 %61 }
  0xb1   :  { %v818_v35 = vmul.f32 0.0078125, %v66_v52  ;;  %v820_v36 = vmul.f32 0.0078125, %v62_v53 }
  0xb3   :  { %v237_v47 = vmul.f32 %v818_v35, %v818_v35  ;;  %v235_v49 = vmul.f32 %v820_v36, %v820_v36 }
  0xb4   :  { %v70_v54 = vpop.xlane.xlu1 %69  ;;  %v68_v55 = vpop.xlane.xlu0 %67 }
  0xb5   :  { %v826_v39 = vmul.f32 0.0078125, %v70_v54  ;;  %v832_v42 = vmul.f32 0.0078125, %v68_v55 }
  0xb7   :  { %v856_v54 = vmul.f32 %v826_v39, %v826_v39 }
  0xb8   :  { %v74_v56 = vpop.xlane.xlu1 %73  ;;  %v72_v57 = vpop.xlane.xlu0 %71 }
  0xb9   :  { %v838_v45 = vmul.f32 0.0078125, %v74_v56  ;;  %v840_v46 = vmul.f32 0.0078125, %v72_v57  ;;  %v238_v57 = vmul.f32 %v832_v42, %v832_v42 }
  0xbb   :  { %v870_v53 = vmul.f32 %v838_v45, %v838_v45 }
  0xbc   :  { %v78_v58 = vpop.xlane.xlu1 %77  ;;  %v76_v59 = vpop.xlane.xlu0 %75 }
  0xbd   :  { %v848_v50 = vmul.f32 0.0078125, %v78_v58  ;;  %v864_v48 = vmul.f32 0.0078125, %v76_v59 }
  0xbf   :  { %v882_v59 = vmul.f32 %v848_v50, %v848_v50 }
  0xc0   :  { %v82_v60 = vpop.xlane.xlu1 %81  ;;  %v80_v61 = vpop.xlane.xlu0 %79 }
  0xc1   :  { %v866_v41 = vmul.f32 0.0078125, %v82_v60  ;;  %v884_v60 = vmul.f32 0.0078125, %v80_v61 }
  0xc3   :  { %1190 = vst [vmem:[#allocation19_spill] sm:$0xff] %v866_v41  ;;  %v898_v61 = vmul.f32 %v866_v41, %v866_v41 }
  0xc4   :  { %v86_v62 = vpop.xlane.xlu1 %85  ;;  %v84_v63 = vpop.xlane.xlu0 %83 }
  0xc5   :  { %v886_v58 = vmul.f32 0.0078125, %v86_v62  ;;  %v900_v62 = vmul.f32 0.0078125, %v84_v63 }
  0xc7   :  { %1191 = vst [vmem:[#allocation20_spill] sm:$0xff] %v886_v58 }
  0xc8   :  { %v90_v24 = vpop.xlane.xlu1 %89  ;;  %v800_v26 = vpop.xlane.xlu0 %87 }
  0xc9   :  { %v914_v16 = vmul.f32 0.0078125, %v90_v24 }
  0xcc   :  { %v802_v27 = vpop.xlane.xlu1 %93  ;;  %v804_v28 = vpop.xlane.xlu0 %91 }
  0xd0   :  { %v806_v29 = vpop.xlane.xlu1 %97  ;;  %v808_v30 = vpop.xlane.xlu0 %95 }
  0xd4   :  { %v810_v31 = vpop.xlane.xlu1 %101  ;;  %v812_v32 = vpop.xlane.xlu0 %99 }
  0xd8   :  { %v822_v37 = vpop.xlane.xlu1 %105  ;;  %v824_v38 = vpop.xlane.xlu0 %103 }
  0xdc   :  { %v850_v51 = vpop.xlane.xlu0 %107  ;;  %v135_v52 = vpop.xlane.xlu1 %134 }
  0xdd   :  { %1189 = vst [vmem:[#allocation18_spill] sm:$0xff] %v850_v51  ;;  %v209_v56 = vmul.f32 0.0078125, %v135_v52  ;;  %v876_v52 = vmul.f32 %v840_v46, %v840_v46 }
  0xdf   :  { %v259_v55 = vsub.f32 %v209_v56, %v234_v43  ;;  %v892_v43 = vmul.f32 %v864_v48, %v864_v48  ;;  %v912_v56 = vmul.f32 %v886_v58, %v886_v58 }
  0xe0   :  { %v137_v22 = vpop.xlane.xlu0 %136  ;;  %v139_v23 = vpop.xlane.xlu1 %138 }
  0xe1   :  { %v284_v20 = vmax.f32 %v259_v55, 0.0  ;;  %v210_v21 = vmul.f32 0.0078125, %v137_v22  ;;  %v211_v18 = vmul.f32 0.0078125, %v139_v23  ;;  %v906_v23 = vmul.f32 %v884_v60, %v884_v60 }
  0xe3   :  { %v309_v44 = vadd.f32 1e-05, %v284_v20  ;;  %v260_v55 = vsub.f32 %v210_v21, %v235_v49  ;;  %v261_v22 = vsub.f32 %v211_v18, %v236_v40  ;;  %v920_v40 = vmul.f32 %v900_v62, %v900_v62 }
  0xe4   :  { %v141_v63 = vpop.xlane.xlu0 %140  ;;  %v143_v51 = vpop.xlane.xlu1 %142  ;;  %v923_v49 = vmul.f32 0.0078125, %v800_v26 }
  0xe5   :  { %532 = vrsqrt.f32 %v309_v44  ;;  %v285_v25 = vmax.f32 %v260_v55, 0.0  ;;  %v286_v20 = vmax.f32 %v261_v22, 0.0  ;;  %v212_v21 = vmul.f32 0.0078125, %v141_v63 }
  0xe6   :  { %v213_v19 = vmul.f32 0.0078125, %v143_v51  ;;  %v929_v55 = vmul.f32 %v914_v16, %v914_v16  ;;  %v932_v22 = vmul.f32 0.0078125, %v802_v27  ;;  %v935_v63 = vmul.f32 0.0078125, %v804_v28 }
  0xe7   :  { %v310_v41 = vadd.f32 1e-05, %v285_v25  ;;  %v311_v10 = vadd.f32 1e-05, %v286_v20  ;;  %v262_v44 = vsub.f32 %v212_v21, %v237_v47  ;;  %v941_v47 = vmul.f32 %v923_v49, %v923_v49 }
  0xe8   :  { %v263_v18 = vsub.f32 %v213_v19, %v238_v57  ;;  %v145_v26 = vpop.xlane.xlu0 %144  ;;  %v147_v58 = vpop.xlane.xlu1 %146  ;;  %v949_v57 = vmul.f32 %v932_v22, %v932_v22  ;;  %v956_v21 = vmul.f32 0.0078125, %v806_v29  ;;  %v969_v25 = vmul.f32 0.0078125, %v810_v31 }
  0xe9   :  { %534 = vrsqrt.f32 %v310_v41  ;;  %v287_v51 = vmax.f32 %v262_v44, 0.0  ;;  %v214_v12 = vmul.f32 0.0078125, %v145_v26  ;;  %v215_v24 = vmul.f32 0.0078125, %v147_v58 }
  0xea   :  { %536 = vrsqrt.f32 %v311_v10  ;;  %v288_v27 = vmax.f32 %v263_v18, 0.0  ;;  %v953_v58 = vmul.f32 %v935_v63, %v935_v63  ;;  %1192 = vst [vmem:[#allocation21_spill] sm:$0xff] %v956_v21  ;;  %1194 = vst [vmem:[#allocation23_spill] sm:$0xff] %v969_v25 }
  0xeb   :  { %v312_v20 = vadd.f32 1e-05, %v287_v51  ;;  %v264_v19 = vsub.f32 %v214_v12, %v856_v54  ;;  %v265_v41 = vsub.f32 %v215_v24, %v876_v52  ;;  %v961_v52 = vmul.f32 0.0078125, %v808_v30  ;;  %v966_v24 = vld [vmem:[%s1160_s1] ss:$0 sm:$0xff] }
  0xec   :  { %v313_v10 = vadd.f32 1e-05, %v288_v27  ;;  %v149_v18 = vpop.xlane.xlu0 %148  ;;  %v151_v44 = vpop.xlane.xlu1 %150  ;;  %v977_v30 = vmul.f32 0.0078125, %v812_v32  ;;  %v1196_v54 = vsub.f32 %v677_v1, %v816_v34 }
  0xed   :  { %538 = vrsqrt.f32 %v312_v20  ;;  %v289_v26 = vmax.f32 %v264_v19, 0.0  ;;  %v290_v51 = vmax.f32 %v265_v41, 0.0  ;;  %v216_v12 = vmul.f32 0.0078125, %v149_v18  ;;  %1193 = vst [vmem:[#allocation22_spill] sm:$0xff] %v961_v52 }
  0xee   :  { %540 = vrsqrt.f32 %v313_v10  ;;  %v217_v29 = vmul.f32 0.0078125, %v151_v44  ;;  %v974_v18 = vmul.f32 %v956_v21, %v956_v21  ;;  %1195 = vst [vmem:[#allocation24_spill] sm:$0xff] %v977_v30  ;;  %v990_v32 = vmul.f32 %v961_v52, %v961_v52 }
  0xef   :  { %v533_v27 = vpop.eup %532  ;;  %v314_v20 = vadd.f32 1e-05, %v289_v26  ;;  %v315_v19 = vadd.f32 1e-05, %v290_v51  ;;  %v266_v41 = vsub.f32 %v216_v12, %v870_v53  ;;  %v986_v26 = vld [vmem:[%s1161_s2] ss:$0 sm:$0xff] }
  0xf0   :  { %v384_v10 = vmul.f32 %v533_v27, %v1196_v54  ;;  %v267_v44 = vsub.f32 %v217_v29, %v892_v43  ;;  %v153_v28 = vpop.xlane.xlu0 %152  ;;  %v155_v31 = vpop.xlane.xlu1 %154  ;;  %v995_v54 = vmul.f32 %v969_v25, %v969_v25  ;;  %s637_s2 = smov [#allocation5]  }
  0xf1   :  { %542 = vrsqrt.f32 %v314_v20  ;;  %v291_v53 = vmax.f32 %v266_v41, 0.0  ;;  %v218_v51 = vmul.f32 0.0078125, %v153_v28  ;;  %v219_v12 = vmul.f32 0.0078125, %v155_v31  ;;  %s506_s30 = sshll.u32 %s637_s2, 4  ;;  %s507_s30 = int_to_ptr.vmem [resolvable:$true] %s506_s30 }
  0xf2   :  { %v416_v1 = vmul.f32 %v966_v24, %v384_v10  ;;  %544 = vrsqrt.f32 %v315_v19  ;;  %v292_v34 = vmax.f32 %v267_v44, 0.0  ;;  %v1001_v41 = vmul.f32 %v977_v30, %v977_v30  ;;  %s606_s7 = scalar_lea.vmem %s507_s30, 3200  ;;  %p611_p13 = scmp.lt.s32.totalorder %s507_s30, %s507_s30 }
  0xf3   :  { %v535_v43 = vpop.eup %534  ;;  %v316_v29 = vadd.f32 1e-05, %v291_v53  ;;  %v268_v27 = vsub.f32 %v218_v51, %v882_v59  ;;  %v269_v20 = vsub.f32 %v219_v12, %v906_v23  ;;  %v1197_v19 = vsub.f32 %v683_v3, %v820_v36  ;;  %p607_p12 = scmp.ne.s32.totalorder %s507_s30, %s606_s7  ;;  %p612_p0 = scmp.lt.s32.totalorder %s606_s7, %s606_s7 }
  0xf4   :  { %v537_v28 = vpop.eup %536  ;;  %v448_v31 = vadd.f32 %v986_v26, %v416_v1  ;;  %v317_v44 = vadd.f32 1e-05, %v292_v34  ;;  %v157_v21 = vpop.xlane.xlu0 %156  ;;  %v1198_v53 = vsub.f32 %v675_v0, %v814_v33  ;;  %v1012_v3 = vmul.f32 0.0078125, %v822_v37 }
  0xf5   :  { %v385_v10 = vmul.f32 %v535_v43, %v1197_v19  ;;  %v159_v25 = vpop.xlane.xlu1 %158  ;;  %546 = vrsqrt.f32 %v316_v29  ;;  %v293_v23 = vmax.f32 %v268_v27, 0.0  ;;  %v294_v51 = vmax.f32 %v269_v20, 0.0  ;;  %p613_p1 = por %p612_p0, %p611_p13 }
  0xf6   :  { %v386_v59 = vmul.f32 %v537_v28, %v1198_v53  ;;  %473 = vst [vmem:[#allocation5] sm:$0xff] %v448_v31  ;;  %548 = vrsqrt.f32 %v317_v44  ;;  %v220_v30 = vmul.f32 0.0078125, %v157_v21  ;;  %v221_v1 = vmul.f32 0.0078125, %v159_v25 }
  0xf7   :  { %v417_v12 = vmul.f32 %v966_v24, %v385_v10  ;;  %v539_v52 = vpop.eup %538  ;;  %v318_v34 = vadd.f32 1e-05, %v293_v23  ;;  %v319_v43 = vadd.f32 1e-05, %v294_v51  ;;  %v1199_v33 = vsub.f32 %v681_v2, %v818_v35  ;;  %p614_p2 = pnand %p613_p1, %p607_p12 }
  0xf8   :  { %v418_v36 = vmul.f32 %v966_v24, %v386_v59  ;;  %v541_v19 = vpop.eup %540  ;;  %v270_v27 = vsub.f32 %v220_v30, %v898_v61  ;;  %v271_v21 = vsub.f32 %v221_v1, %v920_v40  ;;  %v161_v25 = vpop.xlane.xlu0 %160  ;;  %v1200_v28 = vsub.f32 %v689_v5, %v832_v42 }
  0xf9   :  { %v449_v0 = vadd.f32 %v986_v26, %v417_v12  ;;  %v387_v29 = vmul.f32 %v539_v52, %v1199_v33  ;;  %v163_v20 = vpop.xlane.xlu1 %162  ;;  %550 = vrsqrt.f32 %v318_v34  ;;  %v222_v10 = vmul.f32 0.0078125, %v161_v25 }
  0xfa   :  { %v450_v37 = vadd.f32 %v986_v26, %v418_v36  ;;  %v388_v31 = vmul.f32 %v541_v19, %v1200_v28  ;;  %552 = vrsqrt.f32 %v319_v43  ;;  %v295_v2 = vmax.f32 %v270_v27, 0.0 }
  0xfb   :  { %474 = vst [vmem:[#allocation5 + $0x8] sm:$0xff] %v449_v0  ;;  %v419_v44 = vmul.f32 %v966_v24, %v387_v29  ;;  %v296_v35 = vmax.f32 %v271_v21, 0.0  ;;  %v543_v52 = vpop.eup %542  ;;  %v1027_v61 = vmul.f32 0.0078125, %v824_v38  ;;  %v272_v30 = vsub.f32 %v222_v10, %v912_v56 }
  0xfc   :  { %475 = vst [vmem:[#allocation5 + $0x10] sm:$0xff] %v450_v37  ;;  %v420_v40 = vmul.f32 %v966_v24, %v388_v31  ;;  %v223_v53 = vmul.f32 0.0078125, %v163_v20  ;;  %v545_v5 = vpop.eup %544  ;;  %v1201_v59 = vsub.f32 %v687_v4, %v826_v39  ;;  %v320_v51 = vadd.f32 1e-05, %v295_v2  ;;  %v165_v1 = vpop.xlane.xlu0 %164 }
  0xfd   :  { %v451_v42 = vadd.f32 %v986_v26, %v419_v44  ;;  %v321_v12 = vadd.f32 1e-05, %v296_v35  ;;  %v167_v36 = vpop.xlane.xlu1 %166  ;;  %v1202_v34 = vsub.f32 %v695_v7, %v840_v46  ;;  %v297_v19 = vmax.f32 %v272_v30, 0.0 }
  0xfe   :  { %v389_v23 = vmul.f32 %v543_v52, %v1201_v59  ;;  %v452_v38 = vadd.f32 %v986_v26, %v420_v40  ;;  %v273_v56 = vsub.f32 %v223_v53, %v941_v47  ;;  %554 = vrsqrt.f32 %v320_v51 }
  0xff   :  { %v390_v43 = vmul.f32 %v545_v5, %v1202_v34  ;;  %476 = vst [vmem:[#allocation5 + $0x18] sm:$0xff] %v451_v42  ;;  %v224_v33 = vmul.f32 0.0078125, %v165_v1  ;;  %v225_v4 = vmul.f32 0.0078125, %v167_v36  ;;  %v547_v39 = vpop.eup %546  ;;  %556 = vrsqrt.f32 %v321_v12 }
 0x100   :  { %v421_v0 = vmul.f32 %v966_v24, %v389_v23  ;;  %477 = vst [vmem:[#allocation5 + $0x20] sm:$0xff] %v452_v38  ;;  %v322_v27 = vadd.f32 1e-05, %v297_v19  ;;  %v298_v21 = vmax.f32 %v273_v56, 0.0  ;;  %v549_v25 = vpop.eup %548  ;;  %v1203_v46 = vsub.f32 %v693_v6, %v838_v45  ;;  %v169_v28 = vpop.xlane.xlu0 %168 }
 0x101   :  { %v422_v29 = vmul.f32 %v966_v24, %v390_v43  ;;  %v274_v20 = vsub.f32 %v224_v33, %v929_v55  ;;  %v275_v37 = vsub.f32 %v225_v4, %v953_v58  ;;  %v171_v31 = vpop.xlane.xlu1 %170  ;;  %v1204_v44 = vsub.f32 %v701_v9, %v864_v48 }
 0x102   :  { %v453_v7 = vadd.f32 %v986_v26, %v421_v0  ;;  %v391_v47 = vmul.f32 %v547_v39, %v1203_v46  ;;  %558 = vrsqrt.f32 %v322_v27  ;;  %v323_v35 = vadd.f32 1e-05, %v298_v21 }
 0x103   :  { %v454_v10 = vadd.f32 %v986_v26, %v422_v29  ;;  %v392_v2 = vmul.f32 %v549_v25, %v1204_v44  ;;  %v299_v40 = vmax.f32 %v274_v20, 0.0  ;;  %v300_v6 = vmax.f32 %v275_v37, 0.0  ;;  %v551_v30 = vpop.eup %550  ;;  %v1207_v25 = vld [vmem:[#allocation8_spill] sm:$0xff] }
 0x104   :  { %478 = vst [vmem:[#allocation5 + $0x28] sm:$0xff] %v453_v7  ;;  %v423_v52 = vmul.f32 %v966_v24, %v391_v47  ;;  %v226_v45 = vmul.f32 0.0078125, %v169_v28  ;;  %v1055_v55 = vmul.f32 %v1012_v3, %v1012_v3  ;;  %560 = vrsqrt.f32 %v323_v35  ;;  %v553_v9 = vpop.eup %552  ;;  %v173_v51 = vpop.xlane.xlu0 %172  ;;  %v1208_v7 = vld [vmem:[#allocation19_spill] sm:$0xff] }
 0x105   :  { %479 = vst [vmem:[#allocation5 + $0x30] sm:$0xff] %v454_v10  ;;  %v424_v58 = vmul.f32 %v966_v24, %v392_v2  ;;  %v227_v53 = vmul.f32 0.0078125, %v171_v31  ;;  %v1205_v5 = vsub.f32 %v699_v8, %v848_v50  ;;  %v324_v59 = vadd.f32 1e-05, %v299_v40  ;;  %v175_v12 = vpop.xlane.xlu1 %174  ;;  %v1211_v2 = vld [vmem:[#allocation18_spill] sm:$0xff] }
 0x106   :  { %v455_v48 = vadd.f32 %v986_v26, %v423_v52  ;;  %v325_v23 = vadd.f32 1e-05, %v300_v6  ;;  %v1206_v36 = vsub.f32 %v707_v11, %v884_v60  ;;  %v276_v34 = vsub.f32 %v226_v45, %v949_v57  ;;  %v1212_v45 = vld [vmem:[#allocation9_spill] sm:$0xff] }
 0x107   :  { %v393_v42 = vmul.f32 %v551_v30, %v1205_v5  ;;  %v456_v1 = vadd.f32 %v986_v26, %v424_v58  ;;  %v277_v43 = vsub.f32 %v227_v53, %v990_v32  ;;  %562 = vrsqrt.f32 %v324_v59  ;;  %v1213_v30 = vld [vmem:[#allocation20_spill] sm:$0xff] }
 0x108   :  { %v394_v38 = vmul.f32 %v553_v9, %v1206_v36  ;;  %480 = vst [vmem:[#allocation5 + $0x38] sm:$0xff] %v455_v48  ;;  %v228_v8 = vmul.f32 0.0078125, %v173_v51  ;;  %v229_v50 = vmul.f32 0.0078125, %v175_v12  ;;  %564 = vrsqrt.f32 %v325_v23  ;;  %v555_v4 = vpop.eup %554  ;;  %v177_v39 = vpop.xlane.xlu0 %176 }
 0x109   :  { %v425_v19 = vmul.f32 %v966_v24, %v393_v42  ;;  %481 = vst [vmem:[#allocation5 + $0x40] sm:$0xff] %v456_v1  ;;  %v301_v0 = vmax.f32 %v276_v34, 0.0  ;;  %v302_v33 = vmax.f32 %v277_v43, 0.0  ;;  %v256_v11 = vmul.f32 %v1027_v61, %v1027_v61  ;;  %v179_v29 = vpop.xlane.xlu1 %178  ;;  %v557_v27 = vpop.eup %556 }
 0x10a   :  { %v426_v56 = vmul.f32 %v966_v24, %v394_v38  ;;  %v278_v57 = vsub.f32 %v228_v8, %v974_v18  ;;  %v279_v32 = vsub.f32 %v229_v50, %v1001_v41  ;;  %v1209_v46 = vsub.f32 %v1207_v25, %v1208_v7  ;;  %v1219_v7 = vld [vmem:[#allocation22_spill] sm:$0xff] }
 0x10b   :  { %v457_v60 = vadd.f32 %v986_v26, %v425_v19  ;;  %v326_v20 = vadd.f32 1e-05, %v301_v0  ;;  %v327_v37 = vadd.f32 1e-05, %v302_v33  ;;  %v1210_v28 = vsub.f32 %v713_v13, %v900_v62 }
 0x10c   :  { %v458_v21 = vadd.f32 %v986_v26, %v426_v56  ;;  %v395_v47 = vmul.f32 %v555_v4, %v1209_v46  ;;  %v303_v10 = vmax.f32 %v278_v57, 0.0  ;;  %v304_v18 = vmax.f32 %v279_v32, 0.0  ;;  %v559_v41 = vpop.eup %558  ;;  %v181_v62 = vpop.xlane.xlu0 %180  ;;  %v1220_v46 = vld [vmem:[#allocation12_spill] sm:$0xff] }
 0x10d   :  { %482 = vst [vmem:[#allocation5 + $0x48] sm:$0xff] %v457_v60  ;;  %v396_v31 = vmul.f32 %v557_v27, %v1210_v28  ;;  %v230_v44 = vmul.f32 0.0078125, %v177_v39  ;;  %v1083_v35 = vmul.f32 0.0078125, %v1211_v2  ;;  %566 = vrsqrt.f32 %v326_v20  ;;  %v183_v23 = vpop.xlane.xlu1 %182  ;;  %v1223_v2 = vld [vmem:[#allocation24_spill] sm:$0xff] }
 0x10e   :  { %483 = vst [vmem:[#allocation5 + $0x50] sm:$0xff] %v458_v21  ;;  %v427_v52 = vmul.f32 %v966_v24, %v395_v47  ;;  %v231_v40 = vmul.f32 0.0078125, %v179_v29  ;;  %v1214_v58 = vsub.f32 %v1212_v45, %v1213_v30  ;;  %568 = vrsqrt.f32 %v327_v37  ;;  %v561_v9 = vpop.eup %560  ;;  %v1218_v21 = vld [vmem:[#allocation10_spill] sm:$0xff] }
 0x10f   :  { %v428_v6 = vmul.f32 %v966_v24, %v396_v31  ;;  %v328_v13 = vadd.f32 1e-05, %v303_v10  ;;  %v329_v5 = vadd.f32 1e-05, %v304_v18  ;;  %v280_v42 = vsub.f32 %v230_v44, %v995_v54  ;;  %v1221_v10 = vld [vmem:[#allocation21_spill] sm:$0xff]  ;;  %v1222_v18 = vld [vmem:[#allocation11_spill] sm:$0xff] }
 0x110   :  { %v397_v53 = vmul.f32 %v559_v41, %v1214_v58  ;;  %v459_v48 = vadd.f32 %v986_v26, %v427_v52  ;;  %v281_v59 = vsub.f32 %v231_v40, %v256_v11  ;;  %v1215_v1 = vsub.f32 %v719_v15, %v923_v49  ;;  %v1224_v52 = vld [vmem:[#allocation14_spill] sm:$0xff] }
 0x111   :  { %v460_v51 = vadd.f32 %v986_v26, %v428_v6  ;;  %570 = vrsqrt.f32 %v328_v13  ;;  %v305_v38 = vmax.f32 %v280_v42, 0.0  ;;  %v232_v43 = vmul.f32 0.0078125, %v181_v62  ;;  %v563_v19 = vpop.eup %562 }
 0x112   :  { %v429_v12 = vmul.f32 %v966_v24, %v397_v53  ;;  %v398_v36 = vmul.f32 %v561_v9, %v1215_v1  ;;  %484 = vst [vmem:[#allocation5 + $0x58] sm:$0xff] %v459_v48  ;;  %572 = vrsqrt.f32 %v329_v5  ;;  %v306_v34 = vmax.f32 %v281_v59, 0.0  ;;  %v565_v0 = vpop.eup %564  ;;  %v1225_v48 = vld [vmem:[#allocation23_spill] sm:$0xff]  ;;  %v1226_v5 = vld [vmem:[#allocation13_spill] sm:$0xff] }
 0x113   :  { %v258_v54 = vmul.f32 %v1083_v35, %v1083_v35  ;;  %485 = vst [vmem:[#allocation5 + $0x60] sm:$0xff] %v460_v51  ;;  %v233_v56 = vmul.f32 0.0078125, %v183_v23  ;;  %v1216_v15 = vsub.f32 %v717_v14, %v914_v16  ;;  %v330_v33 = vadd.f32 1e-05, %v305_v38  ;;  %v1227_v51 = vld [vmem:[#allocation16_spill] sm:$0xff] }
 0x114   :  { %v461_v8 = vadd.f32 %v986_v26, %v429_v12  ;;  %v430_v50 = vmul.f32 %v966_v24, %v398_v36  ;;  %v331_v4 = vadd.f32 1e-05, %v306_v34  ;;  %v282_v11 = vsub.f32 %v232_v43, %v1055_v55 }
 0x115   :  { %v399_v49 = vmul.f32 %v563_v19, %v1216_v15  ;;  %v1217_v57 = vsub.f32 %v725_v17, %v935_v63  ;;  %v283_v39 = vsub.f32 %v233_v56, %v258_v54  ;;  %574 = vrsqrt.f32 %v330_v33  ;;  %v1228_v19 = vld [vmem:[#allocation15_spill] sm:$0xff]  ;;  %v1229_v56 = vld [vmem:[#allocation17_spill] sm:$0xff] }
 0x116   :  { %486 = vst [vmem:[#allocation5 + $0x68] sm:$0xff] %v461_v8  ;;  %v462_v60 = vadd.f32 %v986_v26, %v430_v50  ;;  %v307_v27 = vmax.f32 %v282_v11, 0.0  ;;  %v376_v14 = vsub.f32 %v1218_v21, %v932_v22  ;;  %576 = vrsqrt.f32 %v331_v4 }
 0x117   :  { %v400_v32 = vmul.f32 %v565_v0, %v1217_v57  ;;  %v431_v29 = vmul.f32 %v966_v24, %v399_v49  ;;  %v308_v55 = vmax.f32 %v283_v39, 0.0  ;;  %v567_v25 = vpop.eup %566  ;;  %v377_v47 = vsub.f32 %v1220_v46, %v1219_v7 }
 0x118   :  { %487 = vst [vmem:[#allocation5 + $0x70] sm:$0xff] %v462_v60  ;;  %v332_v63 = vadd.f32 1e-05, %v307_v27  ;;  %v569_v20 = vpop.eup %568  ;;  %v401_v28 = vmul.f32 %v567_v25, %v376_v14  ;;  %v378_v22 = vsub.f32 %v1222_v18, %v1221_v10  ;;  %v379_v40 = vsub.f32 %v1224_v52, %v1223_v2 }
 0x119   :  { %v432_v16 = vmul.f32 %v966_v24, %v400_v32  ;;  %v463_v17 = vadd.f32 %v986_v26, %v431_v29  ;;  %v333_v31 = vadd.f32 1e-05, %v308_v55  ;;  %v402_v44 = vmul.f32 %v569_v20, %v377_v47 }
 0x11a   :  { %578 = vrsqrt.f32 %v332_v63  ;;  %v433_v6 = vmul.f32 %v966_v24, %v401_v28  ;;  %v380_v42 = vsub.f32 %v1226_v5, %v1225_v48  ;;  %v381_v12 = vsub.f32 %v1227_v51, %v1027_v61 }
 0x11b   :  { %v464_v37 = vadd.f32 %v986_v26, %v432_v16  ;;  %488 = vst [vmem:[#allocation5 + $0x78] sm:$0xff] %v463_v17  ;;  %v571_v41 = vpop.eup %570  ;;  %580 = vrsqrt.f32 %v333_v31  ;;  %v434_v30 = vmul.f32 %v966_v24, %v402_v44  ;;  %v382_v54 = vsub.f32 %v1228_v19, %v1012_v3 }
 0x11c   :  { %v573_v45 = vpop.eup %572  ;;  %v403_v58 = vmul.f32 %v571_v41, %v378_v22  ;;  %v465_v53 = vadd.f32 %v986_v26, %v433_v6  ;;  %v383_v61 = vsub.f32 %v1229_v56, %v1083_v35 }
 0x11d   :  { %489 = vst [vmem:[#allocation5 + $0x80] sm:$0xff] %v464_v37  ;;  %v404_v13 = vmul.f32 %v573_v45, %v379_v40  ;;  %v466_v62 = vadd.f32 %v986_v26, %v434_v30 }
 0x11e   :  { %v435_v9 = vmul.f32 %v966_v24, %v403_v58  ;;  %490 = vst [vmem:[#allocation5 + $0x88] sm:$0xff] %v465_v53 }
 0x11f   :  { %v436_v59 = vmul.f32 %v966_v24, %v404_v13  ;;  %v575_v23 = vpop.eup %574  ;;  %491 = vst [vmem:[#allocation5 + $0x90] sm:$0xff] %v466_v62 }
 0x120   :  { %v467_v1 = vadd.f32 %v986_v26, %v435_v9  ;;  %v577_v36 = vpop.eup %576  ;;  %v405_v34 = vmul.f32 %v575_v23, %v380_v42 }
 0x121   :  { %v468_v38 = vadd.f32 %v986_v26, %v436_v59  ;;  %v406_v43 = vmul.f32 %v577_v36, %v381_v12 }
 0x122   :  { %492 = vst [vmem:[#allocation5 + $0x98] sm:$0xff] %v467_v1  ;;  %v437_v8 = vmul.f32 %v966_v24, %v405_v34 }
 0x123   :  { %493 = vst [vmem:[#allocation5 + $0xa0] sm:$0xff] %v468_v38  ;;  %v438_v0 = vmul.f32 %v966_v24, %v406_v43 }
 0x124   :  { %v579_v50 = vpop.eup %578  ;;  %v469_v49 = vadd.f32 %v986_v26, %v437_v8 }
 0x125   :  { %v581_v15 = vpop.eup %580  ;;  %v407_v33 = vmul.f32 %v579_v50, %v382_v54  ;;  %v470_v4 = vadd.f32 %v986_v26, %v438_v0 }
 0x126   :  { %v408_v11 = vmul.f32 %v581_v15, %v383_v61  ;;  %494 = vst [vmem:[#allocation5 + $0xa8] sm:$0xff] %v469_v49 }
 0x127   :  { %v439_v3 = vmul.f32 %v966_v24, %v407_v33  ;;  %495 = vst [vmem:[#allocation5 + $0xb0] sm:$0xff] %v470_v4 }
 0x128   :  { %v440_v60 = vmul.f32 %v966_v24, %v408_v11 }
 0x129   :  { %v471_v57 = vadd.f32 %v986_v26, %v439_v3 }
 0x12a   :  { %v472_v35 = vadd.f32 %v986_v26, %v440_v60 }
 0x12b   :  { %496 = vst [vmem:[#allocation5 + $0xb8] sm:$0xff] %v471_v57 }
 0x12c   :  { %497 = vst [vmem:[#allocation5 + $0xc0] sm:$0xff] %v472_v35 }
 0x12d   :  { %617 = shalt.err (!%p614_p2)
}
 0x12e   :  { %s618_s8 = scalar_lea.hbm %s505_s6, 3200  ;;  %s620_s11 = scalar_lea.hbm %s1162_s3, 3200 }
 0x12f   :  { %p619_p3 = scmp.ne.s32.totalorder %s505_s6, %s618_s8  ;;  %p621_p4 = scmp.lt.u32.totalorder %s505_s6, %s1162_s3 }
 0x130   :  { %p622_p5 = scmp.lt.u32.totalorder %s620_s11, %s618_s8  ;;  %p624_p7 = scmp.lt.u32.totalorder %s618_s8, %s505_s6 }
 0x132   :  { %p623_p6 = por %p622_p5, %p621_p4 }
 0x134   :  { %p625_p8 = por %p624_p7, %p623_p6 }
 0x136   :  { %p626_p9 = pnand %p625_p8, %p619_p3 }
 0x138   :  { %629 = shalt.err (!%p626_p9)
}
 0x139   :  { %512 = dma.vmem_to_hbm [thread:$0]  %s507_s30, 3200, %s505_s6, [#allocation4], %s635_s26, %s635_s26, %s636_s27  }
 0x13a   :  { %632 = dma.done.wait [#allocation4], 3200  }
 0x13b   :  { %633 = vsyncadd [#allocation4], 4294964096 }
 0x13c   :  { %516 = vsyncpa [#allocation3], 1 }
 0x13d   :  { %517 = vsyncpa [#allocation4], 1 }

// kernel: tpu_custom_call.1
= control target key start
LH: loop header
LB: loop body
LE: loop exit
PB: predicated region body
PF: predicated region fallthrough
CT: control target
= control target key end

     0   :  { %8 = vsyncpa [#allocation3], 0  ;;  %s1138_s0 = inlined_call_operand.hbm [shape: f32[200,128], index: 0, kind: input, shape index: {}]   ;;  %s1139_s1 = inlined_call_operand.vmem [shape: f32[1,128], index: 1, kind: input, shape index: {}]   ;;  %s1140_s2 = inlined_call_operand.vmem [shape: f32[1,128], index: 2, kind: input, shape index: {}]   ;;  %s1141_s3 = inlined_call_operand.hbm [shape: f32[200,128], index: 3, kind: output, shape index: {}]  }
   0x1   :  { %9 = vsyncpa [#allocation4], 0  ;;  %s614_s12 = smov [#allocation2]   ;;  %s566_s16 = scalar_lea.hbm %s1138_s0, 3200 }
   0x2   :  { %s15_s13 = sshll.u32 %s614_s12, 4  ;;  %p567_p0 = scmp.ne.s32.totalorder %s1138_s0, %s566_s16  ;;  %s16_s13 = int_to_ptr.vmem [resolvable:$true] %s15_s13 }
   0x3   :  { %p570_p1 = scmp.lt.u32.totalorder %s566_s16, %s1138_s0 }
   0x5   :  { %p572_p2 = pnand %p570_p1, %p567_p0 }
   0x7   :  { %575 = shalt.err (!%p572_p2)
}
   0x8   :  { %s576_s21 = scalar_lea.vmem %s16_s13, 3200  ;;  %p581_p4 = scmp.lt.s32.totalorder %s16_s13, %s16_s13 }
   0x9   :  { %p577_p3 = scmp.ne.s32.totalorder %s16_s13, %s576_s21  ;;  %p582_p5 = scmp.lt.s32.totalorder %s576_s21, %s576_s21 }
   0xb   :  { %p583_p6 = por %p582_p5, %p581_p4 }
   0xd   :  { %p584_p7 = pnand %p583_p6, %p577_p3 }
   0xf   :  { %587 = shalt.err (!%p584_p7)
}
  0x10   :  { %s615_s22 = smov 128   ;;  %s616_s23 = smov 8  }
  0x11   :  { %21 = dma.hbm_to_vmem [thread:$0]  %s1138_s0, 3200, %s16_s13, [#allocation3], %s615_s22, %s615_s22, %s616_s23  }
  0x12   :  { %610 = dma.done.wait [#allocation3], 3200  }
  0x13   :  { %611 = vsyncadd [#allocation3], 4294964096  ;;  %v653_v0 = vld [vmem:[#allocation2 + $0x10] sm:$0xff]  ;;  %v655_v1 = vld [vmem:[#allocation2] sm:$0xff] }
  0x14   :  { %58 = vadd.xlane.f32.xlu1 %v653_v0  ;;  %54 = vadd.xlane.f32.xlu0 %v655_v1  ;;  %v659_v2 = vld [vmem:[#allocation2 + $0x18] sm:$0xff]  ;;  %v661_v3 = vld [vmem:[#allocation2 + $0x8] sm:$0xff]  ;;  %v667_v5 = vld [vmem:[#allocation2 + $0x20] sm:$0xff]  ;;  %v104_v24 = vmul.f32 %v655_v1, %v655_v1  ;;  %v106_v27 = vmul.f32 %v653_v0, %v653_v0 }
  0x15   :  { %v665_v4 = vld [vmem:[#allocation2 + $0x28] sm:$0xff]  ;;  %v671_v6 = vld [vmem:[#allocation2 + $0x38] sm:$0xff]  ;;  %v673_v7 = vld [vmem:[#allocation2 + $0x30] sm:$0xff]  ;;  %v105_v26 = vmul.f32 %v661_v3, %v661_v3  ;;  %v107_v28 = vmul.f32 %v659_v2, %v659_v2  ;;  %v108_v29 = vmul.f32 %v667_v5, %v667_v5 }
  0x16   :  { %v677_v8 = vld [vmem:[#allocation2 + $0x48] sm:$0xff]  ;;  %v679_v9 = vld [vmem:[#allocation2 + $0x40] sm:$0xff]  ;;  %v683_v10 = vld [vmem:[#allocation2 + $0x58] sm:$0xff]  ;;  %v109_v30 = vmul.f32 %v665_v4, %v665_v4  ;;  %v110_v31 = vmul.f32 %v673_v7, %v673_v7  ;;  %v111_v32 = vmul.f32 %v671_v6, %v671_v6 }
  0x17   :  { %1158 = vst [vmem:[#allocation8_spill] sm:$0xff] %v683_v10  ;;  %v685_v11 = vld [vmem:[#allocation2 + $0x50] sm:$0xff]  ;;  %v689_v12 = vld [vmem:[#allocation2 + $0x68] sm:$0xff]  ;;  %v691_v13 = vld [vmem:[#allocation2 + $0x60] sm:$0xff]  ;;  %v112_v33 = vmul.f32 %v679_v9, %v679_v9  ;;  %v113_v34 = vmul.f32 %v677_v8, %v677_v8  ;;  %v115_v36 = vmul.f32 %v683_v10, %v683_v10 }
  0x18   :  { %60 = vadd.xlane.f32.xlu1 %v659_v2  ;;  %56 = vadd.xlane.f32.xlu0 %v661_v3  ;;  %1159 = vst [vmem:[#allocation9_spill] sm:$0xff] %v689_v12  ;;  %v695_v14 = vld [vmem:[#allocation2 + $0x78] sm:$0xff]  ;;  %v697_v15 = vld [vmem:[#allocation2 + $0x70] sm:$0xff]  ;;  %v701_v16 = vld [vmem:[#allocation2 + $0x88] sm:$0xff]  ;;  %v114_v35 = vmul.f32 %v685_v11, %v685_v11  ;;  %v116_v37 = vmul.f32 %v691_v13, %v691_v13 }
  0x19   :  { %1160 = vst [vmem:[#allocation10_spill] sm:$0xff] %v701_v16  ;;  %v703_v17 = vld [vmem:[#allocation2 + $0x80] sm:$0xff]  ;;  %v707_v18 = vld [vmem:[#allocation2 + $0x98] sm:$0xff]  ;;  %v709_v19 = vld [vmem:[#allocation2 + $0x90] sm:$0xff]  ;;  %v117_v38 = vmul.f32 %v689_v12, %v689_v12  ;;  %v118_v39 = vmul.f32 %v697_v15, %v697_v15  ;;  %v119_v40 = vmul.f32 %v695_v14, %v695_v14  ;;  %v121_v42 = vmul.f32 %v701_v16, %v701_v16 }
  0x1a   :  { %1161 = vst [vmem:[#allocation11_spill] sm:$0xff] %v707_v18  ;;  %1162 = vst [vmem:[#allocation12_spill] sm:$0xff] %v709_v19  ;;  %v713_v20 = vld [vmem:[#allocation2 + $0xa8] sm:$0xff]  ;;  %v715_v21 = vld [vmem:[#allocation2 + $0xa0] sm:$0xff]  ;;  %v120_v41 = vmul.f32 %v703_v17, %v703_v17  ;;  %v122_v43 = vmul.f32 %v709_v19, %v709_v19  ;;  %v123_v44 = vmul.f32 %v707_v18, %v707_v18 }
  0x1b   :  { %1163 = vst [vmem:[#allocation13_spill] sm:$0xff] %v713_v20  ;;  %1164 = vst [vmem:[#allocation14_spill] sm:$0xff] %v715_v21  ;;  %v719_v22 = vld [vmem:[#allocation2 + $0xb8] sm:$0xff]  ;;  %v721_v23 = vld [vmem:[#allocation2 + $0xb0] sm:$0xff]  ;;  %v124_v45 = vmul.f32 %v715_v21, %v715_v21  ;;  %v125_v46 = vmul.f32 %v713_v20, %v713_v20 }
  0x1c   :  { %64 = vadd.xlane.f32.xlu1 %v665_v4  ;;  %62 = vadd.xlane.f32.xlu0 %v667_v5  ;;  %1165 = vst [vmem:[#allocation15_spill] sm:$0xff] %v719_v22  ;;  %1166 = vst [vmem:[#allocation16_spill] sm:$0xff] %v721_v23  ;;  %v727_v25 = vld [vmem:[#allocation2 + $0xc0] sm:$0xff]  ;;  %v126_v47 = vmul.f32 %v721_v23, %v721_v23  ;;  %v127_v48 = vmul.f32 %v719_v22, %v719_v22 }
  0x1d   :  { %1167 = vst [vmem:[#allocation17_spill] sm:$0xff] %v727_v25  ;;  %v128_v49 = vmul.f32 %v727_v25, %v727_v25 }
  0x20   :  { %68 = vadd.xlane.f32.xlu1 %v671_v6  ;;  %66 = vadd.xlane.f32.xlu0 %v673_v7 }
  0x24   :  { %72 = vadd.xlane.f32.xlu1 %v677_v8  ;;  %70 = vadd.xlane.f32.xlu0 %v679_v9 }
  0x28   :  { %76 = vadd.xlane.f32.xlu1 %v683_v10  ;;  %74 = vadd.xlane.f32.xlu0 %v685_v11 }
  0x2c   :  { %80 = vadd.xlane.f32.xlu1 %v689_v12  ;;  %78 = vadd.xlane.f32.xlu0 %v691_v13 }
  0x30   :  { %84 = vadd.xlane.f32.xlu1 %v695_v14  ;;  %82 = vadd.xlane.f32.xlu0 %v697_v15 }
  0x34   :  { %88 = vadd.xlane.f32.xlu1 %v701_v16  ;;  %86 = vadd.xlane.f32.xlu0 %v703_v17 }
  0x38   :  { %92 = vadd.xlane.f32.xlu1 %v707_v18  ;;  %90 = vadd.xlane.f32.xlu0 %v709_v19 }
  0x3c   :  { %96 = vadd.xlane.f32.xlu1 %v713_v20  ;;  %94 = vadd.xlane.f32.xlu0 %v715_v21 }
  0x40   :  { %100 = vadd.xlane.f32.xlu1 %v719_v22  ;;  %98 = vadd.xlane.f32.xlu0 %v721_v23 }
  0x44   :  { %102 = vadd.xlane.f32.xlu0 %v727_v25  ;;  %129 = vadd.xlane.f32.xlu1 %v104_v24 }
  0x48   :  { %131 = vadd.xlane.f32.xlu0 %v105_v26  ;;  %133 = vadd.xlane.f32.xlu1 %v106_v27 }
  0x4c   :  { %135 = vadd.xlane.f32.xlu0 %v107_v28  ;;  %137 = vadd.xlane.f32.xlu1 %v108_v29 }
  0x50   :  { %139 = vadd.xlane.f32.xlu0 %v109_v30  ;;  %141 = vadd.xlane.f32.xlu1 %v110_v31 }
  0x54   :  { %143 = vadd.xlane.f32.xlu0 %v111_v32  ;;  %145 = vadd.xlane.f32.xlu1 %v112_v33 }
  0x58   :  { %147 = vadd.xlane.f32.xlu0 %v113_v34  ;;  %149 = vadd.xlane.f32.xlu1 %v114_v35 }
  0x5c   :  { %151 = vadd.xlane.f32.xlu0 %v115_v36  ;;  %153 = vadd.xlane.f32.xlu1 %v116_v37 }
  0x60   :  { %155 = vadd.xlane.f32.xlu0 %v117_v38  ;;  %157 = vadd.xlane.f32.xlu1 %v118_v39 }
  0x64   :  { %159 = vadd.xlane.f32.xlu0 %v119_v40  ;;  %161 = vadd.xlane.f32.xlu1 %v120_v41 }
  0x68   :  { %163 = vadd.xlane.f32.xlu0 %v121_v42  ;;  %165 = vadd.xlane.f32.xlu1 %v122_v43 }
  0x6c   :  { %167 = vadd.xlane.f32.xlu0 %v123_v44  ;;  %169 = vadd.xlane.f32.xlu1 %v124_v45 }
  0x70   :  { %171 = vadd.xlane.f32.xlu0 %v125_v46  ;;  %173 = vadd.xlane.f32.xlu1 %v126_v47 }
  0x74   :  { %175 = vadd.xlane.f32.xlu0 %v127_v48  ;;  %177 = vadd.xlane.f32.xlu1 %v128_v49 }
  0xa1   :  { %v59_v50 = vpop.xlane.xlu1 %58  ;;  %v55_v51 = vpop.xlane.xlu0 %54 }
  0xa2   :  { %v792_v33 = vmul.f32 0.0078125, %v59_v50  ;;  %v794_v34 = vmul.f32 0.0078125, %v55_v51 }
  0xa4   :  { %v231_v40 = vmul.f32 %v792_v33, %v792_v33  ;;  %v229_v43 = vmul.f32 %v794_v34, %v794_v34 }
  0xa5   :  { %v61_v52 = vpop.xlane.xlu1 %60  ;;  %v57_v53 = vpop.xlane.xlu0 %56 }
  0xa6   :  { %v796_v35 = vmul.f32 0.0078125, %v61_v52  ;;  %v798_v36 = vmul.f32 0.0078125, %v57_v53 }
  0xa8   :  { %v232_v47 = vmul.f32 %v796_v35, %v796_v35  ;;  %v230_v49 = vmul.f32 %v798_v36, %v798_v36 }
  0xa9   :  { %v65_v54 = vpop.xlane.xlu1 %64  ;;  %v63_v55 = vpop.xlane.xlu0 %62 }
  0xaa   :  { %v804_v39 = vmul.f32 0.0078125, %v65_v54  ;;  %v810_v42 = vmul.f32 0.0078125, %v63_v55 }
  0xac   :  { %v834_v54 = vmul.f32 %v804_v39, %v804_v39 }
  0xad   :  { %v69_v56 = vpop.xlane.xlu1 %68  ;;  %v67_v57 = vpop.xlane.xlu0 %66 }
  0xae   :  { %v816_v45 = vmul.f32 0.0078125, %v69_v56  ;;  %v818_v46 = vmul.f32 0.0078125, %v67_v57  ;;  %v233_v57 = vmul.f32 %v810_v42, %v810_v42 }
  0xb0   :  { %v848_v53 = vmul.f32 %v816_v45, %v816_v45 }
  0xb1   :  { %v73_v58 = vpop.xlane.xlu1 %72  ;;  %v71_v59 = vpop.xlane.xlu0 %70 }
  0xb2   :  { %v826_v50 = vmul.f32 0.0078125, %v73_v58  ;;  %v842_v48 = vmul.f32 0.0078125, %v71_v59 }
  0xb4   :  { %v860_v59 = vmul.f32 %v826_v50, %v826_v50 }
  0xb5   :  { %v77_v60 = vpop.xlane.xlu1 %76  ;;  %v75_v61 = vpop.xlane.xlu0 %74 }
  0xb6   :  { %v844_v41 = vmul.f32 0.0078125, %v77_v60  ;;  %v862_v60 = vmul.f32 0.0078125, %v75_v61 }
  0xb8   :  { %1169 = vst [vmem:[#allocation19_spill] sm:$0xff] %v844_v41  ;;  %v876_v61 = vmul.f32 %v844_v41, %v844_v41 }
  0xb9   :  { %v81_v62 = vpop.xlane.xlu1 %80  ;;  %v79_v63 = vpop.xlane.xlu0 %78 }
  0xba   :  { %v864_v58 = vmul.f32 0.0078125, %v81_v62  ;;  %v878_v62 = vmul.f32 0.0078125, %v79_v63 }
  0xbc   :  { %1170 = vst [vmem:[#allocation20_spill] sm:$0xff] %v864_v58 }
  0xbd   :  { %v85_v24 = vpop.xlane.xlu1 %84  ;;  %v778_v26 = vpop.xlane.xlu0 %82 }
  0xbe   :  { %v892_v16 = vmul.f32 0.0078125, %v85_v24 }
  0xc1   :  { %v780_v27 = vpop.xlane.xlu1 %88  ;;  %v782_v28 = vpop.xlane.xlu0 %86 }
  0xc5   :  { %v784_v29 = vpop.xlane.xlu1 %92  ;;  %v786_v30 = vpop.xlane.xlu0 %90 }
  0xc9   :  { %v788_v31 = vpop.xlane.xlu1 %96  ;;  %v790_v32 = vpop.xlane.xlu0 %94 }
  0xcd   :  { %v800_v37 = vpop.xlane.xlu1 %100  ;;  %v802_v38 = vpop.xlane.xlu0 %98 }
  0xd1   :  { %v828_v51 = vpop.xlane.xlu0 %102  ;;  %v130_v52 = vpop.xlane.xlu1 %129 }
  0xd2   :  { %1168 = vst [vmem:[#allocation18_spill] sm:$0xff] %v828_v51  ;;  %v204_v56 = vmul.f32 0.0078125, %v130_v52  ;;  %v854_v52 = vmul.f32 %v818_v46, %v818_v46 }
  0xd4   :  { %v254_v55 = vsub.f32 %v204_v56, %v229_v43  ;;  %v870_v43 = vmul.f32 %v842_v48, %v842_v48  ;;  %v890_v56 = vmul.f32 %v864_v58, %v864_v58 }
  0xd5   :  { %v132_v22 = vpop.xlane.xlu0 %131  ;;  %v134_v23 = vpop.xlane.xlu1 %133 }
  0xd6   :  { %v279_v20 = vmax.f32 %v254_v55, 0.0  ;;  %v205_v21 = vmul.f32 0.0078125, %v132_v22  ;;  %v206_v18 = vmul.f32 0.0078125, %v134_v23  ;;  %v884_v23 = vmul.f32 %v862_v60, %v862_v60 }
  0xd8   :  { %v304_v44 = vadd.f32 1e-05, %v279_v20  ;;  %v255_v55 = vsub.f32 %v205_v21, %v230_v49  ;;  %v256_v22 = vsub.f32 %v206_v18, %v231_v40  ;;  %v898_v40 = vmul.f32 %v878_v62, %v878_v62 }
  0xd9   :  { %v136_v63 = vpop.xlane.xlu0 %135  ;;  %v138_v51 = vpop.xlane.xlu1 %137  ;;  %v901_v49 = vmul.f32 0.0078125, %v778_v26 }
  0xda   :  { %516 = vrsqrt.f32 %v304_v44  ;;  %v280_v25 = vmax.f32 %v255_v55, 0.0  ;;  %v281_v20 = vmax.f32 %v256_v22, 0.0  ;;  %v207_v21 = vmul.f32 0.0078125, %v136_v63 }
  0xdb   :  { %v208_v19 = vmul.f32 0.0078125, %v138_v51  ;;  %v907_v55 = vmul.f32 %v892_v16, %v892_v16  ;;  %v910_v22 = vmul.f32 0.0078125, %v780_v27  ;;  %v913_v63 = vmul.f32 0.0078125, %v782_v28 }
  0xdc   :  { %v305_v41 = vadd.f32 1e-05, %v280_v25  ;;  %v306_v10 = vadd.f32 1e-05, %v281_v20  ;;  %v257_v44 = vsub.f32 %v207_v21, %v232_v47  ;;  %v919_v47 = vmul.f32 %v901_v49, %v901_v49 }
  0xdd   :  { %v258_v18 = vsub.f32 %v208_v19, %v233_v57  ;;  %v140_v26 = vpop.xlane.xlu0 %139  ;;  %v142_v58 = vpop.xlane.xlu1 %141  ;;  %v927_v57 = vmul.f32 %v910_v22, %v910_v22  ;;  %v934_v21 = vmul.f32 0.0078125, %v784_v29  ;;  %v947_v25 = vmul.f32 0.0078125, %v788_v31 }
  0xde   :  { %518 = vrsqrt.f32 %v305_v41  ;;  %v282_v51 = vmax.f32 %v257_v44, 0.0  ;;  %v209_v12 = vmul.f32 0.0078125, %v140_v26  ;;  %v210_v24 = vmul.f32 0.0078125, %v142_v58 }
  0xdf   :  { %520 = vrsqrt.f32 %v306_v10  ;;  %v283_v27 = vmax.f32 %v258_v18, 0.0  ;;  %v931_v58 = vmul.f32 %v913_v63, %v913_v63  ;;  %1171 = vst [vmem:[#allocation21_spill] sm:$0xff] %v934_v21  ;;  %1173 = vst [vmem:[#allocation23_spill] sm:$0xff] %v947_v25 }
  0xe0   :  { %v307_v20 = vadd.f32 1e-05, %v282_v51  ;;  %v259_v19 = vsub.f32 %v209_v12, %v834_v54  ;;  %v260_v41 = vsub.f32 %v210_v24, %v854_v52  ;;  %v939_v52 = vmul.f32 0.0078125, %v786_v30  ;;  %v944_v24 = vld [vmem:[%s1139_s1] ss:$0 sm:$0xff] }
  0xe1   :  { %v308_v10 = vadd.f32 1e-05, %v283_v27  ;;  %v144_v18 = vpop.xlane.xlu0 %143  ;;  %v146_v44 = vpop.xlane.xlu1 %145  ;;  %v955_v30 = vmul.f32 0.0078125, %v790_v32  ;;  %v1175_v54 = vsub.f32 %v655_v1, %v794_v34 }
  0xe2   :  { %522 = vrsqrt.f32 %v307_v20  ;;  %v284_v26 = vmax.f32 %v259_v19, 0.0  ;;  %v285_v51 = vmax.f32 %v260_v41, 0.0  ;;  %v211_v12 = vmul.f32 0.0078125, %v144_v18  ;;  %1172 = vst [vmem:[#allocation22_spill] sm:$0xff] %v939_v52 }
  0xe3   :  { %524 = vrsqrt.f32 %v308_v10  ;;  %v212_v29 = vmul.f32 0.0078125, %v146_v44  ;;  %v952_v18 = vmul.f32 %v934_v21, %v934_v21  ;;  %1174 = vst [vmem:[#allocation24_spill] sm:$0xff] %v955_v30  ;;  %v968_v32 = vmul.f32 %v939_v52, %v939_v52 }
  0xe4   :  { %v517_v27 = vpop.eup %516  ;;  %v309_v20 = vadd.f32 1e-05, %v284_v26  ;;  %v310_v19 = vadd.f32 1e-05, %v285_v51  ;;  %v261_v41 = vsub.f32 %v211_v12, %v848_v53  ;;  %v964_v26 = vld [vmem:[%s1140_s2] ss:$0 sm:$0xff] }
  0xe5   :  { %v379_v10 = vmul.f32 %v517_v27, %v1175_v54  ;;  %v262_v44 = vsub.f32 %v212_v29, %v870_v43  ;;  %v148_v28 = vpop.xlane.xlu0 %147  ;;  %v150_v31 = vpop.xlane.xlu1 %149  ;;  %v973_v54 = vmul.f32 %v947_v25, %v947_v25  ;;  %s617_s2 = smov [#allocation5]  }
  0xe6   :  { %526 = vrsqrt.f32 %v309_v20  ;;  %v286_v53 = vmax.f32 %v261_v41, 0.0  ;;  %v213_v51 = vmul.f32 0.0078125, %v148_v28  ;;  %v214_v12 = vmul.f32 0.0078125, %v150_v31  ;;  %s498_s28 = sshll.u32 %s617_s2, 4  ;;  %s499_s28 = int_to_ptr.vmem [resolvable:$true] %s498_s28 }
  0xe7   :  { %v411_v1 = vmul.f32 %v944_v24, %v379_v10  ;;  %528 = vrsqrt.f32 %v310_v19  ;;  %v287_v34 = vmax.f32 %v262_v44, 0.0  ;;  %v979_v41 = vmul.f32 %v955_v30, %v955_v30  ;;  %s588_s29 = scalar_lea.vmem %s499_s28, 3200  ;;  %p593_p9 = scmp.lt.s32.totalorder %s499_s28, %s499_s28 }
  0xe8   :  { %v519_v43 = vpop.eup %518  ;;  %v311_v29 = vadd.f32 1e-05, %v286_v53  ;;  %v263_v27 = vsub.f32 %v213_v51, %v860_v59  ;;  %v264_v20 = vsub.f32 %v214_v12, %v884_v23  ;;  %v1176_v19 = vsub.f32 %v661_v3, %v798_v36  ;;  %p589_p8 = scmp.ne.s32.totalorder %s499_s28, %s588_s29  ;;  %p594_p10 = scmp.lt.s32.totalorder %s588_s29, %s588_s29 }
  0xe9   :  { %v521_v28 = vpop.eup %520  ;;  %v443_v31 = vadd.f32 %v964_v26, %v411_v1  ;;  %v312_v44 = vadd.f32 1e-05, %v287_v34  ;;  %v152_v21 = vpop.xlane.xlu0 %151  ;;  %v1177_v53 = vsub.f32 %v653_v0, %v792_v33  ;;  %v990_v3 = vmul.f32 0.0078125, %v800_v37 }
  0xea   :  { %v380_v10 = vmul.f32 %v519_v43, %v1176_v19  ;;  %v154_v25 = vpop.xlane.xlu1 %153  ;;  %530 = vrsqrt.f32 %v311_v29  ;;  %v288_v23 = vmax.f32 %v263_v27, 0.0  ;;  %v289_v51 = vmax.f32 %v264_v20, 0.0  ;;  %p595_p11 = por %p594_p10, %p593_p9 }
  0xeb   :  { %v381_v59 = vmul.f32 %v521_v28, %v1177_v53  ;;  %468 = vst [vmem:[#allocation5] sm:$0xff] %v443_v31  ;;  %532 = vrsqrt.f32 %v312_v44  ;;  %v215_v30 = vmul.f32 0.0078125, %v152_v21  ;;  %v216_v1 = vmul.f32 0.0078125, %v154_v25 }
  0xec   :  { %v412_v12 = vmul.f32 %v944_v24, %v380_v10  ;;  %v523_v52 = vpop.eup %522  ;;  %v313_v34 = vadd.f32 1e-05, %v288_v23  ;;  %v314_v43 = vadd.f32 1e-05, %v289_v51  ;;  %v1178_v33 = vsub.f32 %v659_v2, %v796_v35  ;;  %p596_p12 = pnand %p595_p11, %p589_p8 }
  0xed   :  { %v413_v36 = vmul.f32 %v944_v24, %v381_v59  ;;  %v525_v19 = vpop.eup %524  ;;  %v265_v27 = vsub.f32 %v215_v30, %v876_v61  ;;  %v266_v21 = vsub.f32 %v216_v1, %v898_v40  ;;  %v156_v25 = vpop.xlane.xlu0 %155  ;;  %v1179_v28 = vsub.f32 %v667_v5, %v810_v42 }
  0xee   :  { %v444_v0 = vadd.f32 %v964_v26, %v412_v12  ;;  %v382_v29 = vmul.f32 %v523_v52, %v1178_v33  ;;  %v158_v20 = vpop.xlane.xlu1 %157  ;;  %534 = vrsqrt.f32 %v313_v34  ;;  %v217_v10 = vmul.f32 0.0078125, %v156_v25 }
  0xef   :  { %v445_v37 = vadd.f32 %v964_v26, %v413_v36  ;;  %v383_v31 = vmul.f32 %v525_v19, %v1179_v28  ;;  %536 = vrsqrt.f32 %v314_v43  ;;  %v290_v2 = vmax.f32 %v265_v27, 0.0 }
  0xf0   :  { %469 = vst [vmem:[#allocation5 + $0x8] sm:$0xff] %v444_v0  ;;  %v414_v44 = vmul.f32 %v944_v24, %v382_v29  ;;  %v291_v35 = vmax.f32 %v266_v21, 0.0  ;;  %v527_v52 = vpop.eup %526  ;;  %v1005_v61 = vmul.f32 0.0078125, %v802_v38  ;;  %v267_v30 = vsub.f32 %v217_v10, %v890_v56 }
  0xf1   :  { %470 = vst [vmem:[#allocation5 + $0x10] sm:$0xff] %v445_v37  ;;  %v415_v40 = vmul.f32 %v944_v24, %v383_v31  ;;  %v218_v53 = vmul.f32 0.0078125, %v158_v20  ;;  %v529_v5 = vpop.eup %528  ;;  %v1180_v59 = vsub.f32 %v665_v4, %v804_v39  ;;  %v315_v51 = vadd.f32 1e-05, %v290_v2  ;;  %v160_v1 = vpop.xlane.xlu0 %159 }
  0xf2   :  { %v446_v42 = vadd.f32 %v964_v26, %v414_v44  ;;  %v316_v12 = vadd.f32 1e-05, %v291_v35  ;;  %v162_v36 = vpop.xlane.xlu1 %161  ;;  %v1181_v34 = vsub.f32 %v673_v7, %v818_v46  ;;  %v292_v19 = vmax.f32 %v267_v30, 0.0 }
  0xf3   :  { %v384_v23 = vmul.f32 %v527_v52, %v1180_v59  ;;  %v447_v38 = vadd.f32 %v964_v26, %v415_v40  ;;  %v268_v56 = vsub.f32 %v218_v53, %v919_v47  ;;  %538 = vrsqrt.f32 %v315_v51 }
  0xf4   :  { %v385_v43 = vmul.f32 %v529_v5, %v1181_v34  ;;  %471 = vst [vmem:[#allocation5 + $0x18] sm:$0xff] %v446_v42  ;;  %v219_v33 = vmul.f32 0.0078125, %v160_v1  ;;  %v220_v4 = vmul.f32 0.0078125, %v162_v36  ;;  %v531_v39 = vpop.eup %530  ;;  %540 = vrsqrt.f32 %v316_v12 }
  0xf5   :  { %v416_v0 = vmul.f32 %v944_v24, %v384_v23  ;;  %472 = vst [vmem:[#allocation5 + $0x20] sm:$0xff] %v447_v38  ;;  %v317_v27 = vadd.f32 1e-05, %v292_v19  ;;  %v293_v21 = vmax.f32 %v268_v56, 0.0  ;;  %v533_v25 = vpop.eup %532  ;;  %v1182_v46 = vsub.f32 %v671_v6, %v816_v45  ;;  %v164_v28 = vpop.xlane.xlu0 %163 }
  0xf6   :  { %v417_v29 = vmul.f32 %v944_v24, %v385_v43  ;;  %v269_v20 = vsub.f32 %v219_v33, %v907_v55  ;;  %v270_v37 = vsub.f32 %v220_v4, %v931_v58  ;;  %v166_v31 = vpop.xlane.xlu1 %165  ;;  %v1183_v44 = vsub.f32 %v679_v9, %v842_v48 }
  0xf7   :  { %v448_v7 = vadd.f32 %v964_v26, %v416_v0  ;;  %v386_v47 = vmul.f32 %v531_v39, %v1182_v46  ;;  %542 = vrsqrt.f32 %v317_v27  ;;  %v318_v35 = vadd.f32 1e-05, %v293_v21 }
  0xf8   :  { %v449_v10 = vadd.f32 %v964_v26, %v417_v29  ;;  %v387_v2 = vmul.f32 %v533_v25, %v1183_v44  ;;  %v294_v40 = vmax.f32 %v269_v20, 0.0  ;;  %v295_v6 = vmax.f32 %v270_v37, 0.0  ;;  %v535_v30 = vpop.eup %534  ;;  %v1186_v25 = vld [vmem:[#allocation8_spill] sm:$0xff] }
  0xf9   :  { %473 = vst [vmem:[#allocation5 + $0x28] sm:$0xff] %v448_v7  ;;  %v418_v52 = vmul.f32 %v944_v24, %v386_v47  ;;  %v221_v45 = vmul.f32 0.0078125, %v164_v28  ;;  %v1033_v55 = vmul.f32 %v990_v3, %v990_v3  ;;  %544 = vrsqrt.f32 %v318_v35  ;;  %v537_v9 = vpop.eup %536  ;;  %v168_v51 = vpop.xlane.xlu0 %167  ;;  %v1187_v7 = vld [vmem:[#allocation19_spill] sm:$0xff] }
  0xfa   :  { %474 = vst [vmem:[#allocation5 + $0x30] sm:$0xff] %v449_v10  ;;  %v419_v58 = vmul.f32 %v944_v24, %v387_v2  ;;  %v222_v53 = vmul.f32 0.0078125, %v166_v31  ;;  %v1184_v5 = vsub.f32 %v677_v8, %v826_v50  ;;  %v319_v59 = vadd.f32 1e-05, %v294_v40  ;;  %v170_v12 = vpop.xlane.xlu1 %169  ;;  %v1190_v2 = vld [vmem:[#allocation18_spill] sm:$0xff] }
  0xfb   :  { %v450_v48 = vadd.f32 %v964_v26, %v418_v52  ;;  %v320_v23 = vadd.f32 1e-05, %v295_v6  ;;  %v1185_v36 = vsub.f32 %v685_v11, %v862_v60  ;;  %v271_v34 = vsub.f32 %v221_v45, %v927_v57  ;;  %v1191_v45 = vld [vmem:[#allocation9_spill] sm:$0xff] }
  0xfc   :  { %v388_v42 = vmul.f32 %v535_v30, %v1184_v5  ;;  %v451_v1 = vadd.f32 %v964_v26, %v419_v58  ;;  %v272_v43 = vsub.f32 %v222_v53, %v968_v32  ;;  %546 = vrsqrt.f32 %v319_v59  ;;  %v1192_v30 = vld [vmem:[#allocation20_spill] sm:$0xff] }
  0xfd   :  { %v389_v38 = vmul.f32 %v537_v9, %v1185_v36  ;;  %475 = vst [vmem:[#allocation5 + $0x38] sm:$0xff] %v450_v48  ;;  %v223_v8 = vmul.f32 0.0078125, %v168_v51  ;;  %v224_v50 = vmul.f32 0.0078125, %v170_v12  ;;  %548 = vrsqrt.f32 %v320_v23  ;;  %v539_v4 = vpop.eup %538  ;;  %v172_v39 = vpop.xlane.xlu0 %171 }
  0xfe   :  { %v420_v19 = vmul.f32 %v944_v24, %v388_v42  ;;  %476 = vst [vmem:[#allocation5 + $0x40] sm:$0xff] %v451_v1  ;;  %v296_v0 = vmax.f32 %v271_v34, 0.0  ;;  %v297_v33 = vmax.f32 %v272_v43, 0.0  ;;  %v251_v11 = vmul.f32 %v1005_v61, %v1005_v61  ;;  %v174_v29 = vpop.xlane.xlu1 %173  ;;  %v541_v27 = vpop.eup %540 }
  0xff   :  { %v421_v56 = vmul.f32 %v944_v24, %v389_v38  ;;  %v273_v57 = vsub.f32 %v223_v8, %v952_v18  ;;  %v274_v32 = vsub.f32 %v224_v50, %v979_v41  ;;  %v1188_v46 = vsub.f32 %v1186_v25, %v1187_v7  ;;  %v1198_v7 = vld [vmem:[#allocation22_spill] sm:$0xff] }
 0x100   :  { %v452_v60 = vadd.f32 %v964_v26, %v420_v19  ;;  %v321_v20 = vadd.f32 1e-05, %v296_v0  ;;  %v322_v37 = vadd.f32 1e-05, %v297_v33  ;;  %v1189_v28 = vsub.f32 %v691_v13, %v878_v62 }
 0x101   :  { %v453_v21 = vadd.f32 %v964_v26, %v421_v56  ;;  %v390_v47 = vmul.f32 %v539_v4, %v1188_v46  ;;  %v298_v10 = vmax.f32 %v273_v57, 0.0  ;;  %v299_v18 = vmax.f32 %v274_v32, 0.0  ;;  %v543_v41 = vpop.eup %542  ;;  %v176_v62 = vpop.xlane.xlu0 %175  ;;  %v1199_v46 = vld [vmem:[#allocation12_spill] sm:$0xff] }
 0x102   :  { %477 = vst [vmem:[#allocation5 + $0x48] sm:$0xff] %v452_v60  ;;  %v391_v31 = vmul.f32 %v541_v27, %v1189_v28  ;;  %v225_v44 = vmul.f32 0.0078125, %v172_v39  ;;  %v1061_v35 = vmul.f32 0.0078125, %v1190_v2  ;;  %550 = vrsqrt.f32 %v321_v20  ;;  %v178_v23 = vpop.xlane.xlu1 %177  ;;  %v1202_v2 = vld [vmem:[#allocation24_spill] sm:$0xff] }
 0x103   :  { %478 = vst [vmem:[#allocation5 + $0x50] sm:$0xff] %v453_v21  ;;  %v422_v52 = vmul.f32 %v944_v24, %v390_v47  ;;  %v226_v40 = vmul.f32 0.0078125, %v174_v29  ;;  %v1193_v58 = vsub.f32 %v1191_v45, %v1192_v30  ;;  %552 = vrsqrt.f32 %v322_v37  ;;  %v545_v9 = vpop.eup %544  ;;  %v1197_v21 = vld [vmem:[#allocation10_spill] sm:$0xff] }
 0x104   :  { %v423_v6 = vmul.f32 %v944_v24, %v391_v31  ;;  %v323_v13 = vadd.f32 1e-05, %v298_v10  ;;  %v324_v5 = vadd.f32 1e-05, %v299_v18  ;;  %v275_v42 = vsub.f32 %v225_v44, %v973_v54  ;;  %v1200_v10 = vld [vmem:[#allocation21_spill] sm:$0xff]  ;;  %v1201_v18 = vld [vmem:[#allocation11_spill] sm:$0xff] }
 0x105   :  { %v392_v53 = vmul.f32 %v543_v41, %v1193_v58  ;;  %v454_v48 = vadd.f32 %v964_v26, %v422_v52  ;;  %v276_v59 = vsub.f32 %v226_v40, %v251_v11  ;;  %v1194_v1 = vsub.f32 %v697_v15, %v901_v49  ;;  %v1203_v52 = vld [vmem:[#allocation14_spill] sm:$0xff] }
 0x106   :  { %v455_v51 = vadd.f32 %v964_v26, %v423_v6  ;;  %554 = vrsqrt.f32 %v323_v13  ;;  %v300_v38 = vmax.f32 %v275_v42, 0.0  ;;  %v227_v43 = vmul.f32 0.0078125, %v176_v62  ;;  %v547_v19 = vpop.eup %546 }
 0x107   :  { %v424_v12 = vmul.f32 %v944_v24, %v392_v53  ;;  %v393_v36 = vmul.f32 %v545_v9, %v1194_v1  ;;  %479 = vst [vmem:[#allocation5 + $0x58] sm:$0xff] %v454_v48  ;;  %556 = vrsqrt.f32 %v324_v5  ;;  %v301_v34 = vmax.f32 %v276_v59, 0.0  ;;  %v549_v0 = vpop.eup %548  ;;  %v1204_v48 = vld [vmem:[#allocation23_spill] sm:$0xff]  ;;  %v1205_v5 = vld [vmem:[#allocation13_spill] sm:$0xff] }
 0x108   :  { %v253_v54 = vmul.f32 %v1061_v35, %v1061_v35  ;;  %480 = vst [vmem:[#allocation5 + $0x60] sm:$0xff] %v455_v51  ;;  %v228_v56 = vmul.f32 0.0078125, %v178_v23  ;;  %v1195_v15 = vsub.f32 %v695_v14, %v892_v16  ;;  %v325_v33 = vadd.f32 1e-05, %v300_v38  ;;  %v1206_v51 = vld [vmem:[#allocation16_spill] sm:$0xff] }
 0x109   :  { %v456_v8 = vadd.f32 %v964_v26, %v424_v12  ;;  %v425_v50 = vmul.f32 %v944_v24, %v393_v36  ;;  %v326_v4 = vadd.f32 1e-05, %v301_v34  ;;  %v277_v11 = vsub.f32 %v227_v43, %v1033_v55 }
 0x10a   :  { %v394_v49 = vmul.f32 %v547_v19, %v1195_v15  ;;  %v1196_v57 = vsub.f32 %v703_v17, %v913_v63  ;;  %v278_v39 = vsub.f32 %v228_v56, %v253_v54  ;;  %558 = vrsqrt.f32 %v325_v33  ;;  %v1207_v19 = vld [vmem:[#allocation15_spill] sm:$0xff]  ;;  %v1208_v56 = vld [vmem:[#allocation17_spill] sm:$0xff] }
 0x10b   :  { %481 = vst [vmem:[#allocation5 + $0x68] sm:$0xff] %v456_v8  ;;  %v457_v60 = vadd.f32 %v964_v26, %v425_v50  ;;  %v302_v27 = vmax.f32 %v277_v11, 0.0  ;;  %v371_v14 = vsub.f32 %v1197_v21, %v910_v22  ;;  %560 = vrsqrt.f32 %v326_v4 }
 0x10c   :  { %v395_v32 = vmul.f32 %v549_v0, %v1196_v57  ;;  %v426_v29 = vmul.f32 %v944_v24, %v394_v49  ;;  %v303_v55 = vmax.f32 %v278_v39, 0.0  ;;  %v551_v25 = vpop.eup %550  ;;  %v372_v47 = vsub.f32 %v1199_v46, %v1198_v7 }
 0x10d   :  { %482 = vst [vmem:[#allocation5 + $0x70] sm:$0xff] %v457_v60  ;;  %v327_v63 = vadd.f32 1e-05, %v302_v27  ;;  %v553_v20 = vpop.eup %552  ;;  %v396_v28 = vmul.f32 %v551_v25, %v371_v14  ;;  %v373_v22 = vsub.f32 %v1201_v18, %v1200_v10  ;;  %v374_v40 = vsub.f32 %v1203_v52, %v1202_v2 }
 0x10e   :  { %v427_v16 = vmul.f32 %v944_v24, %v395_v32  ;;  %v458_v17 = vadd.f32 %v964_v26, %v426_v29  ;;  %v328_v31 = vadd.f32 1e-05, %v303_v55  ;;  %v397_v44 = vmul.f32 %v553_v20, %v372_v47 }
 0x10f   :  { %562 = vrsqrt.f32 %v327_v63  ;;  %v428_v6 = vmul.f32 %v944_v24, %v396_v28  ;;  %v375_v42 = vsub.f32 %v1205_v5, %v1204_v48  ;;  %v376_v12 = vsub.f32 %v1206_v51, %v1005_v61 }
 0x110   :  { %v459_v37 = vadd.f32 %v964_v26, %v427_v16  ;;  %483 = vst [vmem:[#allocation5 + $0x78] sm:$0xff] %v458_v17  ;;  %v555_v41 = vpop.eup %554  ;;  %564 = vrsqrt.f32 %v328_v31  ;;  %v429_v30 = vmul.f32 %v944_v24, %v397_v44  ;;  %v377_v54 = vsub.f32 %v1207_v19, %v990_v3 }
 0x111   :  { %v557_v45 = vpop.eup %556  ;;  %v398_v58 = vmul.f32 %v555_v41, %v373_v22  ;;  %v460_v53 = vadd.f32 %v964_v26, %v428_v6  ;;  %v378_v0 = vsub.f32 %v1208_v56, %v1061_v35 }
 0x112   :  { %484 = vst [vmem:[#allocation5 + $0x80] sm:$0xff] %v459_v37  ;;  %v399_v13 = vmul.f32 %v557_v45, %v374_v40  ;;  %v461_v62 = vadd.f32 %v964_v26, %v429_v30 }
 0x113   :  { %v430_v9 = vmul.f32 %v944_v24, %v398_v58  ;;  %485 = vst [vmem:[#allocation5 + $0x88] sm:$0xff] %v460_v53 }
 0x114   :  { %v431_v59 = vmul.f32 %v944_v24, %v399_v13  ;;  %v559_v23 = vpop.eup %558  ;;  %486 = vst [vmem:[#allocation5 + $0x90] sm:$0xff] %v461_v62 }
 0x115   :  { %v462_v1 = vadd.f32 %v964_v26, %v430_v9  ;;  %v561_v36 = vpop.eup %560  ;;  %v400_v34 = vmul.f32 %v559_v23, %v375_v42 }
 0x116   :  { %v463_v38 = vadd.f32 %v964_v26, %v431_v59  ;;  %v401_v43 = vmul.f32 %v561_v36, %v376_v12 }
 0x117   :  { %487 = vst [vmem:[#allocation5 + $0x98] sm:$0xff] %v462_v1  ;;  %v432_v8 = vmul.f32 %v944_v24, %v400_v34 }
 0x118   :  { %488 = vst [vmem:[#allocation5 + $0xa0] sm:$0xff] %v463_v38  ;;  %v433_v61 = vmul.f32 %v944_v24, %v401_v43 }
 0x119   :  { %v563_v50 = vpop.eup %562  ;;  %v464_v49 = vadd.f32 %v964_v26, %v432_v8 }
 0x11a   :  { %v565_v15 = vpop.eup %564  ;;  %v402_v33 = vmul.f32 %v563_v50, %v377_v54  ;;  %v465_v4 = vadd.f32 %v964_v26, %v433_v61 }
 0x11b   :  { %v403_v11 = vmul.f32 %v565_v15, %v378_v0  ;;  %489 = vst [vmem:[#allocation5 + $0xa8] sm:$0xff] %v464_v49 }
 0x11c   :  { %v434_v60 = vmul.f32 %v944_v24, %v402_v33  ;;  %490 = vst [vmem:[#allocation5 + $0xb0] sm:$0xff] %v465_v4 }
 0x11d   :  { %v435_v3 = vmul.f32 %v944_v24, %v403_v11 }
 0x11e   :  { %v466_v57 = vadd.f32 %v964_v26, %v434_v60 }
 0x11f   :  { %v467_v35 = vadd.f32 %v964_v26, %v435_v3 }
 0x120   :  { %491 = vst [vmem:[#allocation5 + $0xb8] sm:$0xff] %v466_v57 }
 0x121   :  { %492 = vst [vmem:[#allocation5 + $0xc0] sm:$0xff] %v467_v35 }
 0x122   :  { %599 = shalt.err (!%p596_p12)
}
 0x123   :  { %s600_s5 = scalar_lea.hbm %s1141_s3, 3200 }
 0x124   :  { %p601_p13 = scmp.ne.s32.totalorder %s1141_s3, %s600_s5  ;;  %p604_p0 = scmp.lt.u32.totalorder %s600_s5, %s1141_s3 }
 0x126   :  { %p606_p1 = pnand %p604_p0, %p601_p13 }
 0x128   :  { %609 = shalt.err (!%p606_p1)
}
 0x129   :  { %504 = dma.vmem_to_hbm [thread:$0]  %s499_s28, 3200, %s1141_s3, [#allocation4], %s615_s22, %s615_s22, %s616_s23  }
 0x12a   :  { %612 = dma.done.wait [#allocation4], 3200  }
 0x12b   :  { %613 = vsyncadd [#allocation4], 4294964096 }
 0x12c   :  { %508 = vsyncpa [#allocation3], 1 }
 0x12d   :  { %509 = vsyncpa [#allocation4], 1 }

</bundles_post_ra>
